<compile_context>
chip_gen: v6e
topology: v6e:2x2x1
jax: 0.10.0
libtpu: 0.0.40
codegen_flags: <defaults>
</compile_context>

<pallas_src>
import functools

import numpy as np

import jax
import jax.numpy as jnp
from jax import lax
from jax.experimental import pallas as pl
from jax.experimental.pallas import tpu as pltpu

_ATTN_EPS = 1e-6   # fast_transformers LinearAttention eps
_LN_EPS = 1e-5     # torch.nn.LayerNorm default eps


def _phi(t):
    """elu(t) + 1 — the fast-transformers elu feature map, written explicitly."""
    return jnp.where(t > 0, t + 1.0, jnp.exp(t))


def _layer_norm(t, g, b):
    mu = jnp.mean(t, axis=-1, keepdims=True)
    tc = t - mu
    var = jnp.mean(tc * tc, axis=-1, keepdims=True)
    return tc * lax.rsqrt(var + _LN_EPS) * g + b


def _ftb_kernel(x_ref, mask_ref,
                w_qkv_ref, b_qkv_ref, w_o_ref, b_o_ref,
                ln_w_ref, ln_b_ref,
                w1_ref, b1_ref, w2_ref, b2_ref,
                lnf_w_ref, lnf_b_ref,
                o_ref, *scratch,
                compute_dtype, batch_tile, approx_recip, use_out_as_acc):
    """One (batch tile, encoder layer) grid step.

    x_ref    : (TB, L, D)      input activations for this batch tile
    mask_ref : (D, D) f32      block-diagonal head mask (1 where same head)
    w_qkv    : (1, D, 3D)      fused Q|K|V projection weights ([in, out]), compute dtype
    b_qkv    : (1, 1, 3D) f32  fused Q|K|V biases
    w_o/b_o  : (1, D, D)/(1,1,D)   attention out projection
    ln_w/b   : (1, 2, D) f32   LayerNorm1 / LayerNorm2 affine params
    w1/b1    : (1, D, F)/(1,1,F)   FFN first linear
    w2/b2    : (1, F, D)/(1,1,D)   FFN second linear
    lnf_w/b  : (1, D) f32      final encoder LayerNorm affine params
    o_ref    : (TB, L, D)      output block (doubles as the running activation
                               when use_out_as_acc)
    scratch  : ((TB*L, D) f32,) running-activation scratch when not use_out_as_acc
    """
    layer = pl.program_id(1)
    n_layers = pl.num_programs(1)
    f32 = jnp.float32
    cdt = compute_dtype

    TB = batch_tile
    _, L, D = x_ref.shape
    rows = TB * L

    if use_out_as_acc:
        # Output block index is constant along the layer axis -> it stays
        # resident in VMEM across layers; use it directly as the accumulator
        # (HBM writeback still happens once per batch tile).
        def read_acc():
            return o_ref[...].reshape(rows, D)

        def write_acc(v):
            o_ref[...] = v.reshape(TB, L, D)
    else:
        h_ref = scratch[0]

        def read_acc():
            return h_ref[...]

        def write_acc(v):
            h_ref[...] = v

    @pl.when(layer == 0)
    def _():
        write_acc(x_ref[...].reshape(rows, D).astype(f32))

    x = read_acc()                           # [rows, D] f32 running activation
    mask = mask_ref[...]                     # [D, D] f32

    # ---------------- linear attention ----------------
    # Fused QKV projection: operands in compute dtype, f32 MXU accumulation.
    xc = x.astype(cdt)
    qkv = jnp.dot(xc, w_qkv_ref[0], preferred_element_type=f32) + b_qkv_ref[0]
    q = qkv[:, :D]
    k = qkv[:, D:2 * D]
    v = qkv[:, 2 * D:]

    phq = _phi(q)
    phk = _phi(k)
    phq_c = phq.astype(cdt)                  # hoisted casts (reused below)
    phk_c = phk.astype(cdt)
    v_c = v.astype(cdt)

    # Per-sequence KV / Ksum aggregation (dense [D,D] matmul + block-diagonal
    # head mask instead of 8-wide lane slicing), unrolled over the batch tile.
    ctx_parts = []
    for tb in range(TB):
        sl = slice(tb * L, (tb + 1) * L)
        kv = lax.dot_general(phk_c[sl], v_c[sl], (((0,), (0,)), ((), ())),
                             preferred_element_type=f32) * mask          # [D, D]
        ksum = jnp.sum(phk[sl], axis=0, keepdims=True)                   # [1, D] f32
        num = jnp.dot(phq_c[sl], kv.astype(cdt),
                      preferred_element_type=f32)                        # [L, D]
        # Denominator path kept fully in f32: ksum grows with L and the matmul
        # is tiny, so this costs nothing and keeps accuracy on the bf16 path.
        den = jnp.dot(phq[sl] * ksum, mask, preferred_element_type=f32)  # [L, D]
        inv = pl.reciprocal(den + _ATTN_EPS, approx=approx_recip)        # EUP slot
        ctx_parts.append(num * inv)
    ctx = ctx_parts[0] if TB == 1 else jnp.concatenate(ctx_parts, axis=0)

    attn = jnp.dot(ctx.astype(cdt), w_o_ref[0],
                   preferred_element_type=f32) + b_o_ref[0]              # [rows, D]

    # ---------------- residual + norm + feed-forward ----------------
    ln_w = ln_w_ref[0]                       # [2, D]
    ln_b = ln_b_ref[0]

    x = _layer_norm(x + attn, ln_w[0:1], ln_b[0:1])

    y = jnp.dot(x.astype(cdt), w1_ref[0], preferred_element_type=f32) + b1_ref[0]
    y = jnp.maximum(y, 0.0)                  # relu
    y = jnp.dot(y.astype(cdt), w2_ref[0], preferred_element_type=f32) + b2_ref[0]

    x = _layer_norm(x + y, ln_w[1:2], ln_b[1:2])

    @pl.when(layer < n_layers - 1)
    def _():
        write_acc(x)

    @pl.when(layer == n_layers - 1)
    def _():
        # Final encoder LayerNorm, written lane-dense once per batch tile.
        out = _layer_norm(x, lnf_w_ref[...], lnf_b_ref[...])
        o_ref[...] = out.reshape(TB, L, D).astype(o_ref.dtype)


def _head_mask(d_model, nhead):
    head = jnp.arange(d_model, dtype=jnp.int32) // (d_model // nhead)
    return (head[:, None] == head[None, :]).astype(jnp.float32)


def _pick_batch_tile(batch, seq_len):
    """Pack several batch elements per grid step: amortizes per-layer weight
    streaming and per-step overhead, raises the MXU M-dim fill. Caps the rows
    per step and tries to keep >= 2 parallel grid steps (two TCs on v7x)."""
    tile = 1
    for cand in range(1, batch + 1):
        if batch % cand:
            continue
        if cand * seq_len > 1024:
            break
        tile = cand
        if cand * seq_len >= 256 and batch // cand >= 2:
            break
    return tile


def _vmem_capacity_bytes():
    try:
        cap = getattr(pltpu.get_tpu_info(), "vmem_capacity_bytes", None)
        if cap:
            return int(cap)
    except Exception:
        pass
    return 64 * 1024 * 1024  # conservative fallback (= v7x physical VMEM)


def fast_transformer_block_forward(x, params, *, nhead,
                                   compute_dtype=jnp.bfloat16,
                                   batch_tile=None):
    """x: [B, L, N] -> [B, L, N] linear-attention transformer encoder."""
    B, L, D = x.shape
    NL = params["w_qkvo"].shape[0]
    F = params["w1"].shape[-1]
    assert D % nhead == 0

    TB = batch_tile if batch_tile is not None else _pick_batch_tile(B, L)
    assert B % TB == 0, (B, TB)
    rows = TB * L

    mask = _head_mask(D, nhead)   # kept f32 (f32 den matmul / f32 kv masking)

    # Fuse Q/K/V into one [D, 3D] projection per layer and pre-cast the large
    # weight matrices to the compute dtype (one-time host-side prep).
    w_qkvo, b_qkvo = params["w_qkvo"], params["b_qkvo"]
    w_qkv = jnp.concatenate([w_qkvo[:, 0], w_qkvo[:, 1], w_qkvo[:, 2]], axis=-1)
    b_qkv = jnp.concatenate([b_qkvo[:, 0], b_qkvo[:, 1], b_qkvo[:, 2]],
                            axis=-1)[:, None, :]
    w_o = w_qkvo[:, 3]
    b_o = b_qkvo[:, 3][:, None, :]

    w_qkv = w_qkv.astype(compute_dtype)
    w_o = w_o.astype(compute_dtype)
    w1 = params["w1"].astype(compute_dtype)
    w2 = params["w2"].astype(compute_dtype)

    use_out_as_acc = (x.dtype == jnp.float32)

    # ----- generation-aware VMEM budget from the actual block footprint -----
    wsize = np.dtype(compute_dtype).itemsize
    per_layer_w = (D * 3 * D + D * D + D * F + F * D) * wsize
    per_layer_b = (3 * D + D + 4 * D + F + D) * 4
    act = rows * D * x.dtype.itemsize
    temps = (18 * rows * D + 4 * rows * F) * 4          # [rows,D]/[rows,F] f32 temps
    footprint = (2 * (per_layer_w + per_layer_b)        # double-buffered layer weights
                 + 2 * act + 2 * act                    # x / out blocks (dbl-buffered)
                 + (0 if use_out_as_acc else rows * D * 4)   # running-act scratch
                 + 2 * D * D * 4                        # head mask
                 + temps)
    cap = _vmem_capacity_bytes()
    vmem_bytes = int(min(max(int(footprint * 1.25), 16 * 1024 * 1024),
                         int(0.85 * cap)))

    kernel = functools.partial(
        _ftb_kernel,
        compute_dtype=compute_dtype,
        batch_tile=TB,
        approx_recip=(compute_dtype != jnp.float32),
        use_out_as_acc=use_out_as_acc,
    )
    scratch_shapes = [] if use_out_as_acc else [pltpu.VMEM((rows, D), jnp.float32)]

    return pl.pallas_call(
        kernel,
        out_shape=jax.ShapeDtypeStruct((B, L, D), x.dtype),
        grid_spec=pltpu.PrefetchScalarGridSpec(
            num_scalar_prefetch=0,
            grid=(B // TB, NL),
            in_specs=[
                pl.BlockSpec((TB, L, D), lambda b, l: (b, 0, 0)),        # x
                pl.BlockSpec((D, D), lambda b, l: (0, 0)),               # head mask
                pl.BlockSpec((1, D, 3 * D), lambda b, l: (l, 0, 0)),     # fused Wqkv
                pl.BlockSpec((1, 1, 3 * D), lambda b, l: (l, 0, 0)),     # fused bqkv
                pl.BlockSpec((1, D, D), lambda b, l: (l, 0, 0)),         # Wo
                pl.BlockSpec((1, 1, D), lambda b, l: (l, 0, 0)),         # bo
                pl.BlockSpec((1, 2, D), lambda b, l: (l, 0, 0)),         # LN gammas
                pl.BlockSpec((1, 2, D), lambda b, l: (l, 0, 0)),         # LN betas
                pl.BlockSpec((1, D, F), lambda b, l: (l, 0, 0)),         # FFN W1
                pl.BlockSpec((1, 1, F), lambda b, l: (l, 0, 0)),         # FFN b1
                pl.BlockSpec((1, F, D), lambda b, l: (l, 0, 0)),         # FFN W2
                pl.BlockSpec((1, 1, D), lambda b, l: (l, 0, 0)),         # FFN b2
                pl.BlockSpec((1, D), lambda b, l: (0, 0)),               # final LN gamma
                pl.BlockSpec((1, D), lambda b, l: (0, 0)),               # final LN beta
            ],
            out_specs=pl.BlockSpec((TB, L, D), lambda b, l: (b, 0, 0)),
            scratch_shapes=scratch_shapes,
        ),
        compiler_params=pltpu.CompilerParams(
            dimension_semantics=("parallel", "arbitrary"),
            vmem_limit_bytes=vmem_bytes,
        ),
    )(x, mask, w_qkv, b_qkv, w_o, b_o,
      params["ln_w"], params["ln_b"],
      w1, params["b1"], w2, params["b2"],
      params["lnf_w"], params["lnf_b"])


def init_params(key, d_model, num_layers, d_ffn):
    """Random params. Torch nn.Linear stores weight as [out, in]; here weights
    are kept pre-transposed as [in, out] so the kernel does row-major matmuls."""
    D, NL, F = d_model, num_layers, d_ffn
    ks = jax.random.split(key, 8)

    def u(k, shape, fan_in):
        bound = 1.0 / jnp.sqrt(jnp.float32(fan_in))
        return jax.random.uniform(k, shape, jnp.float32, -bound, bound)

    return dict(
        w_qkvo=u(ks[0], (NL, 4, D, D), D),
        b_qkvo=u(ks[1], (NL, 4, D), D),
        ln_w=1.0 + 0.1 * jax.random.normal(ks[2], (NL, 2, D), dtype=jnp.float32),
        ln_b=0.1 * jax.random.normal(ks[3], (NL, 2, D), dtype=jnp.float32),
        w1=u(ks[4], (NL, D, F), D),
        b1=u(ks[5], (NL, 1, F), D),
        w2=u(ks[6], (NL, F, D), F),
        b2=u(ks[7], (NL, 1, D), F),
        lnf_w=jnp.ones((1, D), jnp.float32),
        lnf_b=jnp.zeros((1, D), jnp.float32),
    )


def _reference_fast_transformer(x, params, nhead):
    """Pure-JAX f32 (highest-precision) reference using the per-head einsums
    exactly as written in fast_transformers.attention.linear_attention."""
    B, L, D = x.shape
    NL = params["w_qkvo"].shape[0]
    dh = D // nhead
    hi = "highest"
    h = x
    for l in range(NL):
        wq, wk, wv, wo = (params["w_qkvo"][l, i] for i in range(4))
        bq, bk, bv, bo = (params["b_qkvo"][l, i] for i in range(4))
        q = _phi(jnp.dot(h, wq, precision=hi) + bq).reshape(B, L, nhead, dh)
        k = _phi(jnp.dot(h, wk, precision=hi) + bk).reshape(B, L, nhead, dh)
        v = (jnp.dot(h, wv, precision=hi) + bv).reshape(B, L, nhead, dh)
        kv = jnp.einsum("bshd,bshm->bhmd", k, v, precision=hi)
        z = 1.0 / (jnp.einsum("blhd,bhd->blh", q, k.sum(axis=1), precision=hi) + _ATTN_EPS)
        ctx = jnp.einsum("blhd,bhmd,blh->blhm", q, kv, z, precision=hi).reshape(B, L, D)
        attn = jnp.dot(ctx, wo, precision=hi) + bo
        h = _layer_norm(h + attn, params["ln_w"][l, 0], params["ln_b"][l, 0])
        y = jnp.maximum(jnp.dot(h, params["w1"][l], precision=hi) + params["b1"][l, 0], 0.0)
        y = jnp.dot(y, params["w2"][l], precision=hi) + params["b2"][l, 0]
        h = _layer_norm(h + y, params["ln_w"][l, 1], params["ln_b"][l, 1])
    return _layer_norm(h, params["lnf_w"][0], params["lnf_b"][0])


if __name__ == "__main__":
    # Small shapes consistent with FastTransformerBlock('linear', 64):
    # x is [B, L, N]; nhead=8 -> head dim 8; small layer count / d_ffn for the test.
    B, L, D = 2, 16, 64
    NHEAD = 8
    NUM_LAYERS = 2
    D_FFN = 256

    key = jax.random.PRNGKey(0)
    kx, kp = jax.random.split(key)
    x = jax.random.normal(kx, (B, L, D), jnp.float32)
    params = init_params(kp, D, NUM_LAYERS, D_FFN)

    ref = _reference_fast_transformer(x, params, NHEAD)

    # Semantics check: f32 matmul operand path (exact reciprocal).
    out_f32 = jax.block_until_ready(
        fast_transformer_block_forward(x, params, nhead=NHEAD,
                                       compute_dtype=jnp.float32))
    assert out_f32.shape == (B, L, D), out_f32.shape
    err32 = float(jnp.max(jnp.abs(out_f32 - ref)))
    assert jnp.allclose(out_f32, ref, atol=5e-2, rtol=5e-2), f"f32 path mismatch: {err32}"

    # Fast path: bf16 weights/operands on the MXU, f32 accumulation, f32 denominator.
    out_bf16 = jax.block_until_ready(
        fast_transformer_block_forward(x, params, nhead=NHEAD,
                                       compute_dtype=jnp.bfloat16))
    err16 = float(jnp.max(jnp.abs(out_bf16 - ref)))
    assert jnp.allclose(out_bf16, ref, atol=1e-1, rtol=1e-1), f"bf16 path mismatch: {err16}"

    # Also exercise the explicit batch_tile=1 (scratch-accumulator) configuration.
    out_tb1 = jax.block_until_ready(
        fast_transformer_block_forward(x, params, nhead=NHEAD,
                                       compute_dtype=jnp.float32, batch_tile=1))
    assert jnp.allclose(out_tb1, ref, atol=5e-2, rtol=5e-2)

    print("KERNEL_OK")
</pallas_src>

<mosaic_0001>
module attributes {stable_mosaic.version = 11 : i64} {
  func.func @_ftb_kernel(%arg0: i32, %arg1: i32, %arg2: memref<2x16x64xf32, #tpu.memory_space<vmem>>, %arg3: memref<64x64xf32, #tpu.memory_space<vmem>>, %arg4: memref<1x64x192xf32, #tpu.memory_space<vmem>>, %arg5: memref<1x1x192xf32, #tpu.memory_space<vmem>>, %arg6: memref<1x64x64xf32, #tpu.memory_space<vmem>>, %arg7: memref<1x1x64xf32, #tpu.memory_space<vmem>>, %arg8: memref<1x2x64xf32, #tpu.memory_space<vmem>>, %arg9: memref<1x2x64xf32, #tpu.memory_space<vmem>>, %arg10: memref<1x64x256xf32, #tpu.memory_space<vmem>>, %arg11: memref<1x1x256xf32, #tpu.memory_space<vmem>>, %arg12: memref<1x256x64xf32, #tpu.memory_space<vmem>>, %arg13: memref<1x1x64xf32, #tpu.memory_space<vmem>>, %arg14: memref<1x64xf32, #tpu.memory_space<vmem>>, %arg15: memref<1x64xf32, #tpu.memory_space<vmem>>, %arg16: memref<2x16x64xf32, #tpu.memory_space<vmem>>) attributes {dimension_semantics = [#tpu.dimension_semantics<parallel>, #tpu.dimension_semantics<arbitrary>], iteration_bounds = array<i64: 1, 2>, scalar_prefetch = 0 : i64, scratch_operands = 0 : i64, tpu.core_type = #tpu.core_type<tc>, window_params = [{transform_indices = @transform_0, window_bounds = array<i64: 2, 16, 64>}, {pipeline_mode = #tpu.pipeline_mode<synchronous>, transform_indices = @transform_1, window_bounds = array<i64: 64, 64>}, {transform_indices = @transform_2, window_bounds = array<i64: 1, 64, 192>}, {transform_indices = @transform_3, window_bounds = array<i64: 1, 1, 192>}, {transform_indices = @transform_4, window_bounds = array<i64: 1, 64, 64>}, {transform_indices = @transform_5, window_bounds = array<i64: 1, 1, 64>}, {transform_indices = @transform_6, window_bounds = array<i64: 1, 2, 64>}, {transform_indices = @transform_7, window_bounds = array<i64: 1, 2, 64>}, {transform_indices = @transform_8, window_bounds = array<i64: 1, 64, 256>}, {transform_indices = @transform_9, window_bounds = array<i64: 1, 1, 256>}, {transform_indices = @transform_10, window_bounds = array<i64: 1, 256, 64>}, {transform_indices = @transform_11, window_bounds = array<i64: 1, 1, 64>}, {pipeline_mode = #tpu.pipeline_mode<synchronous>, transform_indices = @transform_12, window_bounds = array<i64: 1, 64>}, {pipeline_mode = #tpu.pipeline_mode<synchronous>, transform_indices = @transform_13, window_bounds = array<i64: 1, 64>}, {transform_indices = @transform_14, window_bounds = array<i64: 2, 16, 64>}]} {
    %c0_i32 = arith.constant 0 : i32
    %0 = arith.cmpi eq, %arg1, %c0_i32 : i32
    %1 = arith.extui %0 : i1 to i32
    %c0_i32_0 = arith.constant 0 : i32
    %2 = arith.cmpi ne, %1, %c0_i32_0 : i32
    scf.if %2 {
      %c0_66 = arith.constant 0 : index
      %c0_67 = arith.constant 0 : index
      %c0_68 = arith.constant 0 : index
      %142 = vector.load %arg2[%c0_66, %c0_67, %c0_68] : memref<2x16x64xf32, #tpu.memory_space<vmem>>, vector<2x16x64xf32>
      %143 = vector.shape_cast %142 : vector<2x16x64xf32> to vector<32x64xf32>
      %144 = vector.shape_cast %143 : vector<32x64xf32> to vector<2x16x64xf32>
      %c0_69 = arith.constant 0 : index
      %c0_70 = arith.constant 0 : index
      %c0_71 = arith.constant 0 : index
      %145 = vector.load %arg16[%c0_69, %c0_70, %c0_71] : memref<2x16x64xf32, #tpu.memory_space<vmem>>, vector<2x16x64xf32>
      tpu.vector_store %arg16[%c0_69, %c0_70, %c0_71], %144 {strides = array<i32>} : memref<2x16x64xf32, #tpu.memory_space<vmem>>, vector<2x16x64xf32>,
    } else {
    }
    %c0 = arith.constant 0 : index
    %c0_1 = arith.constant 0 : index
    %c0_2 = arith.constant 0 : index
    %3 = vector.load %arg16[%c0, %c0_1, %c0_2] : memref<2x16x64xf32, #tpu.memory_space<vmem>>, vector<2x16x64xf32>
    %4 = vector.shape_cast %3 : vector<2x16x64xf32> to vector<32x64xf32>
    %c0_3 = arith.constant 0 : index
    %c0_4 = arith.constant 0 : index
    %5 = vector.load %arg3[%c0_3, %c0_4] : memref<64x64xf32, #tpu.memory_space<vmem>>, vector<64x64xf32>
    %c0_5 = arith.constant 0 : index
    %c0_6 = arith.constant 0 : index
    %c0_7 = arith.constant 0 : index
    %6 = vector.load %arg4[%c0_5, %c0_6, %c0_7] : memref<1x64x192xf32, #tpu.memory_space<vmem>>, vector<1x64x192xf32>
    %7 = vector.shape_cast %6 : vector<1x64x192xf32> to vector<64x192xf32>
    %cst = arith.constant dense<0.000000e+00> : vector<32x192xf32>
    %8 = tpu.matmul %4, %7, %cst {dimension_numbers = #tpu.dot_dimension_numbers<[1], [0], [0], [1], [0, 0, 1, 1], [], []>} : vector<32x64xf32>, vector<64x192xf32>, vector<32x192xf32> -> vector<32x192xf32>
    %c0_8 = arith.constant 0 : index
    %c0_9 = arith.constant 0 : index
    %c0_10 = arith.constant 0 : index
    %9 = vector.load %arg5[%c0_8, %c0_9, %c0_10] : memref<1x1x192xf32, #tpu.memory_space<vmem>>, vector<1x1x192xf32>
    %10 = vector.shape_cast %9 : vector<1x1x192xf32> to vector<1x192xf32>
    %11 = vector.broadcast %10 : vector<1x192xf32> to vector<32x192xf32>
    %12 = arith.addf %8, %11 : vector<32x192xf32>
    %13 = vector.extract_strided_slice %12 {offsets = [0, 0], sizes = [32, 64], strides = [1, 1]} : vector<32x192xf32> to vector<32x64xf32>
    %14 = vector.extract_strided_slice %12 {offsets = [0, 64], sizes = [32, 64], strides = [1, 1]} : vector<32x192xf32> to vector<32x64xf32>
    %15 = vector.extract_strided_slice %12 {offsets = [0, 128], sizes = [32, 64], strides = [1, 1]} : vector<32x192xf32> to vector<32x64xf32>
    %cst_11 = arith.constant 0.000000e+00 : f32
    %16 = vector.broadcast %cst_11 : f32 to vector<32x64xf32>
    %17 = arith.cmpf ogt, %13, %16 : vector<32x64xf32>
    %cst_12 = arith.constant 1.000000e+00 : f32
    %18 = vector.broadcast %cst_12 : f32 to vector<32x64xf32>
    %19 = arith.addf %13, %18 : vector<32x64xf32>
    %20 = math.exp %13 : vector<32x64xf32>
    %21 = arith.select %17, %19, %20 : vector<32x64xi1>, vector<32x64xf32>
    %cst_13 = arith.constant 0.000000e+00 : f32
    %22 = vector.broadcast %cst_13 : f32 to vector<32x64xf32>
    %23 = arith.cmpf ogt, %14, %22 : vector<32x64xf32>
    %cst_14 = arith.constant 1.000000e+00 : f32
    %24 = vector.broadcast %cst_14 : f32 to vector<32x64xf32>
    %25 = arith.addf %14, %24 : vector<32x64xf32>
    %26 = math.exp %14 : vector<32x64xf32>
    %27 = arith.select %23, %25, %26 : vector<32x64xi1>, vector<32x64xf32>
    %28 = vector.extract_strided_slice %27 {offsets = [0, 0], sizes = [16, 64], strides = [1, 1]} : vector<32x64xf32> to vector<16x64xf32>
    %29 = vector.extract_strided_slice %15 {offsets = [0, 0], sizes = [16, 64], strides = [1, 1]} : vector<32x64xf32> to vector<16x64xf32>
    %cst_15 = arith.constant dense<0.000000e+00> : vector<64x64xf32>
    %30 = tpu.matmul %28, %29, %cst_15 {dimension_numbers = #tpu.dot_dimension_numbers<[0], [0], [1], [1], [0, 1, 1, 1], [], []>} : vector<16x64xf32>, vector<16x64xf32>, vector<64x64xf32> -> vector<64x64xf32>
    %31 = arith.mulf %30, %5 : vector<64x64xf32>
    %32 = vector.extract_strided_slice %27 {offsets = [0, 0], sizes = [16, 64], strides = [1, 1]} : vector<32x64xf32> to vector<16x64xf32>
    %cst_16 = arith.constant dense<0.000000e+00> : vector<64xf32>
    %33 = vector.multi_reduction <add>, %32, %cst_16 [0] : vector<16x64xf32> to vector<64xf32>
    %34 = vector.shape_cast %33 : vector<64xf32> to vector<1x64xf32>
    %35 = vector.extract_strided_slice %21 {offsets = [0, 0], sizes = [16, 64], strides = [1, 1]} : vector<32x64xf32> to vector<16x64xf32>
    %cst_17 = arith.constant dense<0.000000e+00> : vector<16x64xf32>
    %36 = tpu.matmul %35, %31, %cst_17 {dimension_numbers = #tpu.dot_dimension_numbers<[1], [0], [0], [1], [0, 0, 1, 1], [], []>} : vector<16x64xf32>, vector<64x64xf32>, vector<16x64xf32> -> vector<16x64xf32>
    %37 = vector.extract_strided_slice %21 {offsets = [0, 0], sizes = [16, 64], strides = [1, 1]} : vector<32x64xf32> to vector<16x64xf32>
    %38 = vector.broadcast %34 : vector<1x64xf32> to vector<16x64xf32>
    %39 = arith.mulf %37, %38 : vector<16x64xf32>
    %cst_18 = arith.constant dense<0.000000e+00> : vector<16x64xf32>
    %40 = tpu.matmul %39, %5, %cst_18 {dimension_numbers = #tpu.dot_dimension_numbers<[1], [0], [0], [1], [0, 0, 1, 1], [], []>} : vector<16x64xf32>, vector<64x64xf32>, vector<16x64xf32> -> vector<16x64xf32>
    %cst_19 = arith.constant 9.99999997E-7 : f32
    %41 = vector.broadcast %cst_19 : f32 to vector<16x64xf32>
    %42 = arith.addf %40, %41 : vector<16x64xf32>
    %43 = tpu.reciprocal %42 : vector<16x64xf32> -> vector<16x64xf32>
    %44 = arith.mulf %36, %43 : vector<16x64xf32>
    %45 = vector.extract_strided_slice %27 {offsets = [16, 0], sizes = [16, 64], strides = [1, 1]} : vector<32x64xf32> to vector<16x64xf32>
    %46 = vector.extract_strided_slice %15 {offsets = [16, 0], sizes = [16, 64], strides = [1, 1]} : vector<32x64xf32> to vector<16x64xf32>
    %cst_20 = arith.constant dense<0.000000e+00> : vector<64x64xf32>
    %47 = tpu.matmul %45, %46, %cst_20 {dimension_numbers = #tpu.dot_dimension_numbers<[0], [0], [1], [1], [0, 1, 1, 1], [], []>} : vector<16x64xf32>, vector<16x64xf32>, vector<64x64xf32> -> vector<64x64xf32>
    %48 = arith.mulf %47, %5 : vector<64x64xf32>
    %49 = vector.extract_strided_slice %27 {offsets = [16, 0], sizes = [16, 64], strides = [1, 1]} : vector<32x64xf32> to vector<16x64xf32>
    %cst_21 = arith.constant dense<0.000000e+00> : vector<64xf32>
    %50 = vector.multi_reduction <add>, %49, %cst_21 [0] : vector<16x64xf32> to vector<64xf32>
    %51 = vector.shape_cast %50 : vector<64xf32> to vector<1x64xf32>
    %52 = vector.extract_strided_slice %21 {offsets = [16, 0], sizes = [16, 64], strides = [1, 1]} : vector<32x64xf32> to vector<16x64xf32>
    %cst_22 = arith.constant dense<0.000000e+00> : vector<16x64xf32>
    %53 = tpu.matmul %52, %48, %cst_22 {dimension_numbers = #tpu.dot_dimension_numbers<[1], [0], [0], [1], [0, 0, 1, 1], [], []>} : vector<16x64xf32>, vector<64x64xf32>, vector<16x64xf32> -> vector<16x64xf32>
    %54 = vector.extract_strided_slice %21 {offsets = [16, 0], sizes = [16, 64], strides = [1, 1]} : vector<32x64xf32> to vector<16x64xf32>
    %55 = vector.broadcast %51 : vector<1x64xf32> to vector<16x64xf32>
    %56 = arith.mulf %54, %55 : vector<16x64xf32>
    %cst_23 = arith.constant dense<0.000000e+00> : vector<16x64xf32>
    %57 = tpu.matmul %56, %5, %cst_23 {dimension_numbers = #tpu.dot_dimension_numbers<[1], [0], [0], [1], [0, 0, 1, 1], [], []>} : vector<16x64xf32>, vector<64x64xf32>, vector<16x64xf32> -> vector<16x64xf32>
    %cst_24 = arith.constant 9.99999997E-7 : f32
    %58 = vector.broadcast %cst_24 : f32 to vector<16x64xf32>
    %59 = arith.addf %57, %58 : vector<16x64xf32>
    %60 = tpu.reciprocal %59 : vector<16x64xf32> -> vector<16x64xf32>
    %61 = arith.mulf %53, %60 : vector<16x64xf32>
    %62 = tpu.concatenate %44, %61 in 0 : vector<16x64xf32>, vector<16x64xf32> -> vector<32x64xf32>
    %c0_25 = arith.constant 0 : index
    %c0_26 = arith.constant 0 : index
    %c0_27 = arith.constant 0 : index
    %63 = vector.load %arg6[%c0_25, %c0_26, %c0_27] : memref<1x64x64xf32, #tpu.memory_space<vmem>>, vector<1x64x64xf32>
    %64 = vector.shape_cast %63 : vector<1x64x64xf32> to vector<64x64xf32>
    %cst_28 = arith.constant dense<0.000000e+00> : vector<32x64xf32>
    %65 = tpu.matmul %62, %64, %cst_28 {dimension_numbers = #tpu.dot_dimension_numbers<[1], [0], [0], [1], [0, 0, 1, 1], [], []>} : vector<32x64xf32>, vector<64x64xf32>, vector<32x64xf32> -> vector<32x64xf32>
    %c0_29 = arith.constant 0 : index
    %c0_30 = arith.constant 0 : index
    %c0_31 = arith.constant 0 : index
    %66 = vector.load %arg7[%c0_29, %c0_30, %c0_31] : memref<1x1x64xf32, #tpu.memory_space<vmem>>, vector<1x1x64xf32>
    %67 = vector.shape_cast %66 : vector<1x1x64xf32> to vector<1x64xf32>
    %68 = vector.broadcast %67 : vector<1x64xf32> to vector<32x64xf32>
    %69 = arith.addf %65, %68 : vector<32x64xf32>
    %c0_32 = arith.constant 0 : index
    %c0_33 = arith.constant 0 : index
    %c0_34 = arith.constant 0 : index
    %70 = vector.load %arg8[%c0_32, %c0_33, %c0_34] : memref<1x2x64xf32, #tpu.memory_space<vmem>>, vector<1x2x64xf32>
    %71 = vector.shape_cast %70 : vector<1x2x64xf32> to vector<2x64xf32>
    %c0_35 = arith.constant 0 : index
    %c0_36 = arith.constant 0 : index
    %c0_37 = arith.constant 0 : index
    %72 = vector.load %arg9[%c0_35, %c0_36, %c0_37] : memref<1x2x64xf32, #tpu.memory_space<vmem>>, vector<1x2x64xf32>
    %73 = vector.shape_cast %72 : vector<1x2x64xf32> to vector<2x64xf32>
    %74 = arith.addf %4, %69 : vector<32x64xf32>
    %75 = vector.extract_strided_slice %71 {offsets = [0, 0], sizes = [1, 64], strides = [1, 1]} : vector<2x64xf32> to vector<1x64xf32>
    %76 = vector.extract_strided_slice %73 {offsets = [0, 0], sizes = [1, 64], strides = [1, 1]} : vector<2x64xf32> to vector<1x64xf32>
    %cst_38 = arith.constant dense<0.000000e+00> : vector<32xf32>
    %77 = vector.multi_reduction <add>, %74, %cst_38 [1] : vector<32x64xf32> to vector<32xf32>
    %78 = vector.shape_cast %77 : vector<32xf32> to vector<32x1xf32>
    %cst_39 = arith.constant 6.400000e+01 : f32
    %79 = vector.broadcast %cst_39 : f32 to vector<32x1xf32>
    %80 = arith.divf %78, %79 : vector<32x1xf32>
    %81 = vector.broadcast %80 : vector<32x1xf32> to vector<32x64xf32>
    %82 = arith.subf %74, %81 : vector<32x64xf32>
    %83 = arith.mulf %82, %82 : vector<32x64xf32>
    %cst_40 = arith.constant dense<0.000000e+00> : vector<32xf32>
    %84 = vector.multi_reduction <add>, %83, %cst_40 [1] : vector<32x64xf32> to vector<32xf32>
    %85 = vector.shape_cast %84 : vector<32xf32> to vector<32x1xf32>
    %cst_41 = arith.constant 6.400000e+01 : f32
    %86 = vector.broadcast %cst_41 : f32 to vector<32x1xf32>
    %87 = arith.divf %85, %86 : vector<32x1xf32>
    %cst_42 = arith.constant 9.99999974E-6 : f32
    %88 = vector.broadcast %cst_42 : f32 to vector<32x1xf32>
    %89 = arith.addf %87, %88 : vector<32x1xf32>
    %90 = math.rsqrt %89 : vector<32x1xf32>
    %91 = vector.broadcast %90 : vector<32x1xf32> to vector<32x64xf32>
    %92 = arith.mulf %82, %91 : vector<32x64xf32>
    %93 = vector.broadcast %75 : vector<1x64xf32> to vector<32x64xf32>
    %94 = arith.mulf %92, %93 : vector<32x64xf32>
    %95 = vector.broadcast %76 : vector<1x64xf32> to vector<32x64xf32>
    %96 = arith.addf %94, %95 : vector<32x64xf32>
    %c0_43 = arith.constant 0 : index
    %c0_44 = arith.constant 0 : index
    %c0_45 = arith.constant 0 : index
    %97 = vector.load %arg10[%c0_43, %c0_44, %c0_45] : memref<1x64x256xf32, #tpu.memory_space<vmem>>, vector<1x64x256xf32>
    %98 = vector.shape_cast %97 : vector<1x64x256xf32> to vector<64x256xf32>
    %cst_46 = arith.constant dense<0.000000e+00> : vector<32x256xf32>
    %99 = tpu.matmul %96, %98, %cst_46 {dimension_numbers = #tpu.dot_dimension_numbers<[1], [0], [0], [1], [0, 0, 1, 1], [], []>} : vector<32x64xf32>, vector<64x256xf32>, vector<32x256xf32> -> vector<32x256xf32>
    %c0_47 = arith.constant 0 : index
    %c0_48 = arith.constant 0 : index
    %c0_49 = arith.constant 0 : index
    %100 = vector.load %arg11[%c0_47, %c0_48, %c0_49] : memref<1x1x256xf32, #tpu.memory_space<vmem>>, vector<1x1x256xf32>
    %101 = vector.shape_cast %100 : vector<1x1x256xf32> to vector<1x256xf32>
    %102 = vector.broadcast %101 : vector<1x256xf32> to vector<32x256xf32>
    %103 = arith.addf %99, %102 : vector<32x256xf32>
    %cst_50 = arith.constant 0.000000e+00 : f32
    %104 = vector.broadcast %cst_50 : f32 to vector<32x256xf32>
    %105 = arith.maximumf %103, %104 : vector<32x256xf32>
    %c0_51 = arith.constant 0 : index
    %c0_52 = arith.constant 0 : index
    %c0_53 = arith.constant 0 : index
    %106 = vector.load %arg12[%c0_51, %c0_52, %c0_53] : memref<1x256x64xf32, #tpu.memory_space<vmem>>, vector<1x256x64xf32>
    %107 = vector.shape_cast %106 : vector<1x256x64xf32> to vector<256x64xf32>
    %cst_54 = arith.constant dense<0.000000e+00> : vector<32x64xf32>
    %108 = tpu.matmul %105, %107, %cst_54 {dimension_numbers = #tpu.dot_dimension_numbers<[1], [0], [0], [1], [0, 0, 1, 1], [], []>} : vector<32x256xf32>, vector<256x64xf32>, vector<32x64xf32> -> vector<32x64xf32>
    %c0_55 = arith.constant 0 : index
    %c0_56 = arith.constant 0 : index
    %c0_57 = arith.constant 0 : index
    %109 = vector.load %arg13[%c0_55, %c0_56, %c0_57] : memref<1x1x64xf32, #tpu.memory_space<vmem>>, vector<1x1x64xf32>
    %110 = vector.shape_cast %109 : vector<1x1x64xf32> to vector<1x64xf32>
    %111 = vector.broadcast %110 : vector<1x64xf32> to vector<32x64xf32>
    %112 = arith.addf %108, %111 : vector<32x64xf32>
    %113 = arith.addf %96, %112 : vector<32x64xf32>
    %114 = vector.extract_strided_slice %71 {offsets = [1, 0], sizes = [1, 64], strides = [1, 1]} : vector<2x64xf32> to vector<1x64xf32>
    %115 = vector.extract_strided_slice %73 {offsets = [1, 0], sizes = [1, 64], strides = [1, 1]} : vector<2x64xf32> to vector<1x64xf32>
    %cst_58 = arith.constant dense<0.000000e+00> : vector<32xf32>
    %116 = vector.multi_reduction <add>, %113, %cst_58 [1] : vector<32x64xf32> to vector<32xf32>
    %117 = vector.shape_cast %116 : vector<32xf32> to vector<32x1xf32>
    %cst_59 = arith.constant 6.400000e+01 : f32
    %118 = vector.broadcast %cst_59 : f32 to vector<32x1xf32>
    %119 = arith.divf %117, %118 : vector<32x1xf32>
    %120 = vector.broadcast %119 : vector<32x1xf32> to vector<32x64xf32>
    %121 = arith.subf %113, %120 : vector<32x64xf32>
    %122 = arith.mulf %121, %121 : vector<32x64xf32>
    %cst_60 = arith.constant dense<0.000000e+00> : vector<32xf32>
    %123 = vector.multi_reduction <add>, %122, %cst_60 [1] : vector<32x64xf32> to vector<32xf32>
    %124 = vector.shape_cast %123 : vector<32xf32> to vector<32x1xf32>
    %cst_61 = arith.constant 6.400000e+01 : f32
    %125 = vector.broadcast %cst_61 : f32 to vector<32x1xf32>
    %126 = arith.divf %124, %125 : vector<32x1xf32>
    %cst_62 = arith.constant 9.99999974E-6 : f32
    %127 = vector.broadcast %cst_62 : f32 to vector<32x1xf32>
    %128 = arith.addf %126, %127 : vector<32x1xf32>
    %129 = math.rsqrt %128 : vector<32x1xf32>
    %130 = vector.broadcast %129 : vector<32x1xf32> to vector<32x64xf32>
    %131 = arith.mulf %121, %130 : vector<32x64xf32>
    %132 = vector.broadcast %114 : vector<1x64xf32> to vector<32x64xf32>
    %133 = arith.mulf %131, %132 : vector<32x64xf32>
    %134 = vector.broadcast %115 : vector<1x64xf32> to vector<32x64xf32>
    %135 = arith.addf %133, %134 : vector<32x64xf32>
    %c1_i32 = arith.constant 1 : i32
    %136 = arith.cmpi slt, %arg1, %c1_i32 : i32
    %137 = arith.extui %136 : i1 to i32
    %c0_i32_63 = arith.constant 0 : i32
    %138 = arith.cmpi ne, %137, %c0_i32_63 : i32
    scf.if %138 {
      %142 = vector.shape_cast %135 : vector<32x64xf32> to vector<2x16x64xf32>
      %c0_66 = arith.constant 0 : index
      %c0_67 = arith.constant 0 : index
      %c0_68 = arith.constant 0 : index
      %143 = vector.load %arg16[%c0_66, %c0_67, %c0_68] : memref<2x16x64xf32, #tpu.memory_space<vmem>>, vector<2x16x64xf32>
      tpu.vector_store %arg16[%c0_66, %c0_67, %c0_68], %142 {strides = array<i32>} : memref<2x16x64xf32, #tpu.memory_space<vmem>>, vector<2x16x64xf32>,
    } else {
    }
    %c1_i32_64 = arith.constant 1 : i32
    %139 = arith.cmpi eq, %arg1, %c1_i32_64 : i32
    %140 = arith.extui %139 : i1 to i32
    %c0_i32_65 = arith.constant 0 : i32
    %141 = arith.cmpi ne, %140, %c0_i32_65 : i32
    scf.if %141 {
      %c0_66 = arith.constant 0 : index
      %c0_67 = arith.constant 0 : index
      %142 = vector.load %arg14[%c0_66, %c0_67] : memref<1x64xf32, #tpu.memory_space<vmem>>, vector<1x64xf32>
      %c0_68 = arith.constant 0 : index
      %c0_69 = arith.constant 0 : index
      %143 = vector.load %arg15[%c0_68, %c0_69] : memref<1x64xf32, #tpu.memory_space<vmem>>, vector<1x64xf32>
      %cst_70 = arith.constant dense<0.000000e+00> : vector<32xf32>
      %144 = vector.multi_reduction <add>, %135, %cst_70 [1] : vector<32x64xf32> to vector<32xf32>
      %145 = vector.shape_cast %144 : vector<32xf32> to vector<32x1xf32>
      %cst_71 = arith.constant 6.400000e+01 : f32
      %146 = vector.broadcast %cst_71 : f32 to vector<32x1xf32>
      %147 = arith.divf %145, %146 : vector<32x1xf32>
      %148 = vector.broadcast %147 : vector<32x1xf32> to vector<32x64xf32>
      %149 = arith.subf %135, %148 : vector<32x64xf32>
      %150 = arith.mulf %149, %149 : vector<32x64xf32>
      %cst_72 = arith.constant dense<0.000000e+00> : vector<32xf32>
      %151 = vector.multi_reduction <add>, %150, %cst_72 [1] : vector<32x64xf32> to vector<32xf32>
      %152 = vector.shape_cast %151 : vector<32xf32> to vector<32x1xf32>
      %cst_73 = arith.constant 6.400000e+01 : f32
      %153 = vector.broadcast %cst_73 : f32 to vector<32x1xf32>
      %154 = arith.divf %152, %153 : vector<32x1xf32>
      %cst_74 = arith.constant 9.99999974E-6 : f32
      %155 = vector.broadcast %cst_74 : f32 to vector<32x1xf32>
      %156 = arith.addf %154, %155 : vector<32x1xf32>
      %157 = math.rsqrt %156 : vector<32x1xf32>
      %158 = vector.broadcast %157 : vector<32x1xf32> to vector<32x64xf32>
      %159 = arith.mulf %149, %158 : vector<32x64xf32>
      %160 = vector.broadcast %142 : vector<1x64xf32> to vector<32x64xf32>
      %161 = arith.mulf %159, %160 : vector<32x64xf32>
      %162 = vector.broadcast %143 : vector<1x64xf32> to vector<32x64xf32>
      %163 = arith.addf %161, %162 : vector<32x64xf32>
      %164 = vector.shape_cast %163 : vector<32x64xf32> to vector<2x16x64xf32>
      %c0_75 = arith.constant 0 : index
      %c0_76 = arith.constant 0 : index
      %c0_77 = arith.constant 0 : index
      %165 = vector.load %arg16[%c0_75, %c0_76, %c0_77] : memref<2x16x64xf32, #tpu.memory_space<vmem>>, vector<2x16x64xf32>
      tpu.vector_store %arg16[%c0_75, %c0_76, %c0_77], %164 {strides = array<i32>} : memref<2x16x64xf32, #tpu.memory_space<vmem>>, vector<2x16x64xf32>,
    } else {
    }
    return
  }
  func.func @transform_0(%arg0: i32, %arg1: i32) -> (i32, i32, i32) {
    %c0_i32 = arith.constant 0 : i32
    %c0_i32_0 = arith.constant 0 : i32
    %c0_i32_1 = arith.constant 0 : i32
    return %arg0, %c0_i32, %c0_i32_0 : i32, i32, i32
  }
  func.func @transform_1(%arg0: i32, %arg1: i32) -> (i32, i32) {
    %c0_i32 = arith.constant 0 : i32
    %c0_i32_0 = arith.constant 0 : i32
    %c0_i32_1 = arith.constant 0 : i32
    return %c0_i32, %c0_i32_0 : i32, i32
  }
  func.func @transform_2(%arg0: i32, %arg1: i32) -> (i32, i32, i32) {
    %c0_i32 = arith.constant 0 : i32
    %c0_i32_0 = arith.constant 0 : i32
    %c0_i32_1 = arith.constant 0 : i32
    return %arg1, %c0_i32, %c0_i32_0 : i32, i32, i32
  }
  func.func @transform_3(%arg0: i32, %arg1: i32) -> (i32, i32, i32) {
    %c0_i32 = arith.constant 0 : i32
    %c0_i32_0 = arith.constant 0 : i32
    %c0_i32_1 = arith.constant 0 : i32
    return %arg1, %c0_i32, %c0_i32_0 : i32, i32, i32
  }
  func.func @transform_4(%arg0: i32, %arg1: i32) -> (i32, i32, i32) {
    %c0_i32 = arith.constant 0 : i32
    %c0_i32_0 = arith.constant 0 : i32
    %c0_i32_1 = arith.constant 0 : i32
    return %arg1, %c0_i32, %c0_i32_0 : i32, i32, i32
  }
  func.func @transform_5(%arg0: i32, %arg1: i32) -> (i32, i32, i32) {
    %c0_i32 = arith.constant 0 : i32
    %c0_i32_0 = arith.constant 0 : i32
    %c0_i32_1 = arith.constant 0 : i32
    return %arg1, %c0_i32, %c0_i32_0 : i32, i32, i32
  }
  func.func @transform_6(%arg0: i32, %arg1: i32) -> (i32, i32, i32) {
    %c0_i32 = arith.constant 0 : i32
    %c0_i32_0 = arith.constant 0 : i32
    %c0_i32_1 = arith.constant 0 : i32
    return %arg1, %c0_i32, %c0_i32_0 : i32, i32, i32
  }
  func.func @transform_7(%arg0: i32, %arg1: i32) -> (i32, i32, i32) {
    %c0_i32 = arith.constant 0 : i32
    %c0_i32_0 = arith.constant 0 : i32
    %c0_i32_1 = arith.constant 0 : i32
    return %arg1, %c0_i32, %c0_i32_0 : i32, i32, i32
  }
  func.func @transform_8(%arg0: i32, %arg1: i32) -> (i32, i32, i32) {
    %c0_i32 = arith.constant 0 : i32
    %c0_i32_0 = arith.constant 0 : i32
    %c0_i32_1 = arith.constant 0 : i32
    return %arg1, %c0_i32, %c0_i32_0 : i32, i32, i32
  }
  func.func @transform_9(%arg0: i32, %arg1: i32) -> (i32, i32, i32) {
    %c0_i32 = arith.constant 0 : i32
    %c0_i32_0 = arith.constant 0 : i32
    %c0_i32_1 = arith.constant 0 : i32
    return %arg1, %c0_i32, %c0_i32_0 : i32, i32, i32
  }
  func.func @transform_10(%arg0: i32, %arg1: i32) -> (i32, i32, i32) {
    %c0_i32 = arith.constant 0 : i32
    %c0_i32_0 = arith.constant 0 : i32
    %c0_i32_1 = arith.constant 0 : i32
    return %arg1, %c0_i32, %c0_i32_0 : i32, i32, i32
  }
  func.func @transform_11(%arg0: i32, %arg1: i32) -> (i32, i32, i32) {
    %c0_i32 = arith.constant 0 : i32
    %c0_i32_0 = arith.constant 0 : i32
    %c0_i32_1 = arith.constant 0 : i32
    return %arg1, %c0_i32, %c0_i32_0 : i32, i32, i32
  }
  func.func @transform_12(%arg0: i32, %arg1: i32) -> (i32, i32) {
    %c0_i32 = arith.constant 0 : i32
    %c0_i32_0 = arith.constant 0 : i32
    %c0_i32_1 = arith.constant 0 : i32
    return %c0_i32, %c0_i32_0 : i32, i32
  }
  func.func @transform_13(%arg0: i32, %arg1: i32) -> (i32, i32) {
    %c0_i32 = arith.constant 0 : i32
    %c0_i32_0 = arith.constant 0 : i32
    %c0_i32_1 = arith.constant 0 : i32
    return %c0_i32, %c0_i32_0 : i32, i32
  }
  func.func @transform_14(%arg0: i32, %arg1: i32) -> (i32, i32, i32) {
    %c0_i32 = arith.constant 0 : i32
    %c0_i32_0 = arith.constant 0 : i32
    %c0_i32_1 = arith.constant 0 : i32
    return %arg0, %c0_i32, %c0_i32_0 : i32, i32, i32
  }
}

</mosaic_0001>

<bundles_post_ra>
// kernel: tpu_custom_call.1
= control target key start
LH: loop header
LB: loop body
LE: loop exit
PB: predicated region body
PF: predicated region fallthrough
CT: control target
= control target key end

     0   :  { %s3368_s0 = inlined_call_operand.vmem [shape: f32[2,16,64], index: 0, kind: input, shape index: {}]   ;;  %s3369_s1 = inlined_call_operand.vmem [shape: f32[64,64], index: 1, kind: input, shape index: {}]   ;;  %s3370_s2 = inlined_call_operand.vmem [shape: f32[2,64,192], index: 2, kind: input, shape index: {}]   ;;  %s3371_s3 = inlined_call_operand.vmem [shape: f32[2,1,192], index: 3, kind: input, shape index: {}]   ;;  %s3372_s4 = inlined_call_operand.vmem [shape: f32[2,64,64], index: 4, kind: input, shape index: {}]   ;;  %s3373_s5 = inlined_call_operand.vmem [shape: f32[2,1,64], index: 5, kind: input, shape index: {}]   ;;  %s3374_s6 = inlined_call_operand.vmem [shape: f32[2,2,64], index: 6, kind: input, shape index: {}]   ;;  %s3375_s7 = inlined_call_operand.vmem [shape: f32[2,2,64], index: 7, kind: input, shape index: {}]   ;;  %s3376_s8 = inlined_call_operand.vmem [shape: f32[2,64,256], index: 8, kind: input, shape index: {}]   ;;  %s3377_s9 = inlined_call_operand.vmem [shape: f32[2,1,256], index: 9, kind: input, shape index: {}]   ;;  %s3378_s10 = inlined_call_operand.vmem [shape: f32[2,256,64], index: 10, kind: input, shape index: {}]   ;;  %s3379_s11 = inlined_call_operand.vmem [shape: f32[2,1,64], index: 11, kind: input, shape index: {}]   ;;  %s3380_s12 = inlined_call_operand.vmem [shape: f32[1,64], index: 12, kind: input, shape index: {}]   ;;  %s3381_s13 = inlined_call_operand.vmem [shape: f32[1,64], index: 13, kind: input, shape index: {}]   ;;  %s3382_s14 = inlined_call_operand.hbm [shape: f32[2,16,64], index: 14, kind: output, shape index: {}]  }
   0x1   :  { %3386 = sst [smem:[#allocation8_spill]] %s3369_s1 }
   0x2   :  { %3387 = sst [smem:[#allocation9_spill]] %s3370_s2 }
   0x3   :  { %3388 = sst [smem:[#allocation10_spill]] %s3372_s4 }
   0x4   :  { %3389 = sst [smem:[#allocation11_spill]] %s3380_s12 }
   0x5   :  { %3390 = sst [smem:[#allocation12_spill]] %s3381_s13 }
   0x6   :  { %3391 = sst [smem:[#allocation13_spill]] %s3382_s14 }
   0x7   :  { %19 = vsyncpa [#allocation3], 0  ;;  %s2853_s29 = smov 0   ;;  %s2855_s30 = smov 0  }
   0x8   :  { %s2857_s15 = smov 0  }
   0x9 LB: > { %3392 = sst [smem:[#allocation5_spill]] %s2767_s30  ;;  %s34_s17 = sadd.s32 1, %s2767_s30  ;;  %s2771_s15 = sphi %s2857_s15, %s25_s15   ;;  %s2767_s30 = sphi %s2855_s30, %s3408_s30   ;;  %s2763_s29 = sphi %s2853_s29, %s3407_s29  }
   0xa   : > { %3393 = sst [smem:[#allocation6_spill]] %s2771_s15  ;;  %p35_p0 = scmp.ge.s32.totalorder %s34_s17, 2 }
   0xb   : > { %p2336_p1 = scmp.ge.s32.totalorder %s2771_s15, 1  ;;  %p519_p2 = scmp.lt.s32.totalorder %s2771_s15, 3 }
   0xc   : > { %s3410_s17 = smov (%p35_p0, %s34_s17), 0 }
   0xd   : > { %3394 = sst [smem:[#allocation7_spill]] %s3410_s17  ;;  %p520_p3 = pnand %p2336_p1, %p519_p2 }
   0xe   : > { %p610_p4 = scmp.lt.s32.totalorder (!%p520_p3), %s2763_s29, 1  ;;  %s3395_s2 = sld [smem:[#allocation9_spill]] (!%p520_p3) }
   0xf   : > { %523 = sbr.rel (%p520_p3) target bundleno = 2772 (0xad4), region = 76  ;;  %s3396_s4 = sld [smem:[#allocation10_spill]] (!%p520_p3) }
  0x10   : > { %p2349_p5 = scmp.ne.s32.totalorder (!%p520_p3), %s2763_s29, 0 }
  0x14   : > { %s2876_s18 = scalar_select %p610_p4, %s2763_s29, 1 }
  0x16   : > { %s2396_s19 = sshll.u32 %s2876_s18, 7  ;;  %s2880_s20 = sshll.u32 %s2876_s18, 1 }
  0x17   : > { %s2885_s23 = scalar_lea.vmem %s3395_s2, %s2396_s19  ;;  %s2397_s27 = sshll.u32 %s2876_s18, 6 }
  0x18   : > { %s2899_s15 = scalar_lea.vmem %s3396_s4, %s2397_s27  ;;  %s630_s13 = scalar_lea.vmem %s3374_s6, %s2880_s20 }
  0x19   : > { %s634_s1 = scalar_lea.vmem %s3375_s7, %s2880_s20  ;;  %s2912_s26 = scalar_lea.vmem %s3376_s8, %s2396_s19 }
  0x1a   : > { %s643_s17 = scalar_lea.vmem %s3377_s9, %s2880_s20  ;;  %s2399_s14 = sshll.u32 %s2876_s18, 8 }
  0x1b   : > { %s2922_s4 = scalar_lea.vmem %s3378_s10, %s2399_s14  ;;  %s651_s2 = scalar_lea.vmem %s3379_s11, %s2876_s18 }
  0x1c   : > { %656 = sbr.rel (%p2349_p5) target bundleno = 36 (0x24), region = 80 }
  0x21   : > { %v657_v0 = vld [vmem:[%s3368_s0] sm:$0xff]  ;;  %vm661_vm0 = vcmask 523264   ;;  %v658_v1 = vld [vmem:[%s3368_s0 + $0x8] sm:$0xff]  ;;  %v659_v2 = vld [vmem:[%s3368_s0 + $0x10] sm:$0xff] }
  0x22   : > { %662 = vst.msk [vmem:[#allocation2] sm:$0xff] %vm661_vm0, %v657_v0  ;;  %663 = vst.msk [vmem:[#allocation2 + $0x8] sm:$0xff] %vm661_vm0, %v658_v1  ;;  %v660_v3 = vld [vmem:[%s3368_s0 + $0x18] sm:$0xff] }
  0x23   : > { %664 = vst.msk [vmem:[#allocation2 + $0x10] sm:$0xff] %vm661_vm0, %v659_v2  ;;  %665 = vst.msk [vmem:[#allocation2 + $0x18] sm:$0xff] %vm661_vm0, %v660_v3 }
  0x24 PF: > { %v693_v4 = vld [vmem:[%s2885_s23 + $0x78] sm:$0xff]  ;;  %v692_v5 = vld [vmem:[%s2885_s23 + $0x70] sm:$0xff]  ;;  %v691_v6 = vld [vmem:[%s2885_s23 + $0x68] sm:$0xff]  ;;  %v2773_v8 = vmov 0.0   ;;  %vm706_vm1 = vcmask 523264   ;;  %v696_v25 = vlaneseq  ;;  %s3397_s21 = scalar_lea.vmem %s3371_s3, %s2880_s20  ;;  %s2774_s22 = smov 64  }
  0x25   : > { %735 = vmatprep.subr.mxu0 %v693_v4  ;;  %v690_v7 = vld [vmem:[%s2885_s23 + $0x60] sm:$0xff]  ;;  %783 = vmatprep.mubr.f32.mxu0 %v2773_v8  ;;  %v689_v9 = vld [vmem:[%s2885_s23 + $0x58] sm:$0xff]  ;;  %v688_v10 = vld [vmem:[%s2885_s23 + $0x50] sm:$0xff]  ;;  %vm1006_vm6 = vcmask 1048064   ;;  %vm868_vm7 = vcmask 130048   ;;  %s3398_s24 = sld [smem:[#allocation8_spill]]  ;;  %s3399_s30 = scalar_lea.vmem %s3373_s5, %s2876_s18 }
  0x26   : > { %736 = vmatpush1.msra.mxu0 %v692_v5  ;;  %v687_v11 = vld [vmem:[%s2885_s23 + $0x48] sm:$0xff]  ;;  %v686_v12 = vld [vmem:[%s2885_s23 + $0x40] sm:$0xff]  ;;  %v685_v13 = vld [vmem:[%s2885_s23 + $0x38] sm:$0xff]  ;;  %v697_v26 = vshrl.u32 %v696_v25, 7  ;;  %p2388_p6 = scmp.ge.s32.totalorder %s2763_s29, 1 }
  0x27   : > { %737 = vmatprep.subr.mxu0 %v691_v6  ;;  %v684_v14 = vld [vmem:[%s2885_s23 + $0x30] sm:$0xff]  ;;  %v683_v15 = vld [vmem:[%s2885_s23 + $0x28] sm:$0xff]  ;;  %v682_v16 = vld [vmem:[%s2885_s23 + $0x20] sm:$0xff] }
  0x28   : > { %738 = vmatpush1.msra.mxu0 %v690_v7  ;;  %v681_v17 = vld [vmem:[%s2885_s23 + $0x18] sm:$0xff]  ;;  %v680_v18 = vld [vmem:[%s2885_s23 + $0x10] sm:$0xff]  ;;  %v679_v19 = vld [vmem:[%s2885_s23 + $0x8] sm:$0xff]  ;;  %v2977_v27 = vsub.s32 0, %v697_v26  ;;  %v2985_v32 = vsub.s32 1, %v697_v26 }
  0x29   : > { %739 = vmatprep.subr.mxu0 %v689_v9  ;;  %v678_v20 = vld [vmem:[%s2885_s23] sm:$0xff]  ;;  %v2963_v22 = vld [vmem:[#allocation2 + $0x8] sm:$0xff] }
  0x2a   : > { %740 = vmatpush1.msra.mxu0 %v688_v10  ;;  %v2958_v21 = vld [vmem:[#allocation2] sm:$0xff]  ;;  %v2968_v23 = vld [vmem:[#allocation2 + $0x10] sm:$0xff]  ;;  %v2973_v24 = vld [vmem:[#allocation2 + $0x18] sm:$0xff] }
  0x2b   : > { %741 = vmatprep.subr.mxu0 %v687_v11  ;;  %v694_v28 = vld [vmem:[%s3397_s21] sm:$0x3]  ;;  %v3032_v25 = vld [vmem:[%s3398_s24 + $0x38] sm:$0xff] }
  0x2c   : > { %742 = vmatpush1.msra.mxu0 %v686_v12  ;;  %v699_v29 = vrot.slane %v694_v28, %v2977_v27  ;;  %v2988_v36 = vrot.slane %v694_v28, %v2985_v32  ;;  %v3038_v28 = vld [vmem:[%s3398_s24 + $0x30] sm:$0xff] }
  0x2d   : > { %743 = vmatprep.subr.mxu0 %v685_v13 }
  0x2e   : > { %744 = vmatpush1.msra.mxu0 %v684_v14 }
  0x2f   : > { %745 = vmatprep.subr.mxu0 %v683_v15 }
  0x30   : > { %746 = vmatpush1.msra.mxu0 %v682_v16 }
  0x31   : > { %747 = vmatprep.subr.mxu0 %v681_v17 }
  0x32   : > { %748 = vmatpush1.msra.mxu0 %v680_v18 }
  0x33   : > { %749 = vmatprep.subr.mxu0 %v679_v19 }
  0x34   : > { %750 = vmatpush1.msra.mxu0 %v678_v20 }
  0x35   : > { %2350 = vmatmul.mubr.msk.f32.vlgmr.msra.gmra.mxu0 %vm706_vm1, %v2958_v21  ;;  %2551 = vmatprep.subr.mxu0 %v3032_v25 }
  0x36   : > { %789 = vmatprep.mubr.f32.mxu0 %v2773_v8  ;;  %2552 = vmatpush3.msra.mxu0 %v3032_v25 }
  0x37   : > { %2553 = vmatprep.subr.mxu0 %v3038_v28 }
  0x38   : > { %2554 = vmatpush3.msra.mxu0 %v3038_v28 }
  0x39   : > { %2351 = vmatmul.mubr.msk.f32.gmra.mxu0 %vm706_vm1, %v2963_v22 }
  0x3a   : > { %795 = vmatprep.mubr.f32.mxu0 %v2773_v8 }
  0x3d   : > { %2352 = vmatmul.mubr.msk.f32.gmra.mxu0 %vm706_vm1, %v2968_v23 }
  0x3e   : > { %801 = vmatprep.mubr.f32.mxu0 %v2773_v8 }
  0x41   : > { %2353 = vmatmul.mubr.msk.f32.gmra.mxu0 %vm706_vm1, %v2973_v24 }
  0xf5   : > { %v785_v30 = vpop.f32.mrf.mxu0 }
  0xf6   : > { %v786_v31 = vadd.f32 %v785_v30, %v699_v29 }
  0xf7   : > { %v787_v33 = vpop.f32.mrf.mxu0 }
  0xf8   : > { %v816_v34 = vmul.f32 1.442695, %v786_v31  ;;  %v788_v41 = vadd.f32 %v787_v33, %v2988_v36  ;;  %v812_v45 = vadd.f32 1.0, %v786_v31  ;;  %vm808_vm2 = vcmp.gt.f32.partialorder %v786_v31, 0.0  ;;  %v3052_v31 = vld [vmem:[%s3398_s24 + $0x20] sm:$0xff]  ;;  %v3059_v33 = vld [vmem:[%s3398_s24 + $0x18] sm:$0xff] }
  0xf9   : > { %v791_v35 = vpop.f32.mrf.mxu0 }
  0xfa   : > { %2681 = vpow2.f32 %v816_v34  ;;  %v792_v37 = vadd.f32 %v791_v35, %v699_v29  ;;  %v3066_v35 = vld [vmem:[%s3398_s24 + $0x10] sm:$0xff] }
  0xfb   : > { %v793_v38 = vpop.f32.mrf.mxu0 }
  0xfc   : > { %v818_v39 = vmul.f32 1.442695, %v792_v37  ;;  %v794_v40 = vadd.f32 %v793_v38, %v2988_v36  ;;  %v813_v48 = vadd.f32 1.0, %v792_v37  ;;  %vm809_vm3 = vcmp.gt.f32.partialorder %v792_v37, 0.0  ;;  %v3073_v37 = vld [vmem:[%s3398_s24 + $0x8] sm:$0xff] }
  0xfd   : > { %v797_v42 = vpop.f32.mrf.mxu0 }
  0xfe   : > { %2683 = vpow2.f32 %v818_v39  ;;  %2516 = vmatprep.subr.mxu1 %v794_v40  ;;  %v798_v43 = vadd.f32 %v797_v42, %v699_v29  ;;  %v3080_v39 = vld [vmem:[%s3398_s24] sm:$0xff] }
  0xff   : > { %2517 = vmatpush3.msra.mxu1 %v794_v40  ;;  %v3004_v54 = vpop.f32.mrf.mxu0 }
 0x100   : > { %2518 = vmatprep.subr.mxu1 %v788_v41  ;;  %v820_v44 = vmul.f32 1.442695, %v798_v43  ;;  %v814_v51 = vadd.f32 1.0, %v798_v43  ;;  %vm810_vm4 = vcmp.gt.f32.partialorder %v798_v43, 0.0 }
 0x101   : > { %2519 = vmatpush3.msra.mxu1 %v788_v41  ;;  %v803_v56 = vpop.f32.mrf.mxu0 }
 0x102   : > { %2685 = vpow2.f32 %v820_v44  ;;  %v804_v58 = vadd.f32 %v803_v56, %v699_v29  ;;  %v3045_v29 = vld [vmem:[%s3398_s24 + $0x28] sm:$0xff] }
 0x103   : > { %2555 = vmatprep.subr.mxu0 %v3045_v29 }
 0x104   : > { %v822_v59 = vmul.f32 1.442695, %v804_v58  ;;  %v815_v60 = vadd.f32 1.0, %v804_v58  ;;  %vm811_vm5 = vcmp.gt.f32.partialorder %v804_v58, 0.0  ;;  %2556 = vmatpush3.msra.mxu0 %v3045_v29 }
 0x105   : > { %2557 = vmatprep.subr.mxu0 %v3052_v31 }
 0x106   : > { %2687 = vpow2.f32 %v822_v59  ;;  %2558 = vmatpush3.msra.mxu0 %v3052_v31 }
 0x107   : > { %v2682_v46 = vpop.eup %2681  ;;  %2559 = vmatprep.subr.mxu0 %v3059_v33 }
 0x108   : > { %v2992_v47 = vsel %vm808_vm2, %v812_v45, %v2682_v46  ;;  %2560 = vmatpush3.msra.mxu0 %v3059_v33 }
 0x109   : > { %830 = vrot.lane.b32.xlu0 %v2992_v47, %s2774_s22  ;;  %v1007_v20 = vsel %vm1006_vm6, %v2992_v47, 0.0  ;;  %2561 = vmatprep.subr.mxu0 %v3066_v35 }
 0x10a   : > { %2562 = vmatpush3.msra.mxu0 %v3066_v35 }
 0x10b   : > { %v2684_v49 = vpop.eup %2683  ;;  %2563 = vmatprep.subr.mxu0 %v3073_v37 }
 0x10c   : > { %v2996_v50 = vsel %vm809_vm3, %v813_v48, %v2684_v49  ;;  %2564 = vmatpush3.msra.mxu0 %v3073_v37 }
 0x10d   : > { %832 = vrot.lane.b32.xlu0 %v2996_v50, %s2774_s22  ;;  %v1008_v19 = vsel %vm1006_vm6, %v2996_v50, 0.0  ;;  %2565 = vmatprep.subr.mxu0 %v3080_v39 }
 0x10e   : > { %v1009_v26 = vadd.f32 %v1008_v19, %v1007_v20  ;;  %2566 = vmatpush3.msra.mxu0 %v3080_v39 }
 0x10f   : > { %v2686_v52 = vpop.eup %2685 }
 0x110   : > { %v3000_v53 = vsel %vm810_vm4, %v814_v51, %v2686_v52  ;;  %v1010_v30 = vrot.slane %v1009_v26, 4 }
 0x111   : > { %1188 = vrot.lane.b32.xlu0 %v3000_v53, %s2774_s22  ;;  %v1363_v0 = vsel %vm1006_vm6, %v3000_v53, 0.0 }
 0x112   : > { %v1011_v34 = vadd.f32 %v1010_v30, %v1009_v26 }
 0x113   : > { %v2688_v61 = vpop.eup %2687 }
 0x114   : > { %v3006_v63 = vsel %vm811_vm5, %v815_v60, %v2688_v61  ;;  %v1012_v38 = vrot.slane %v1011_v34, 2 }
 0x115   : > { %v1364_v1 = vsel %vm1006_vm6, %v3006_v63, 0.0 }
 0x116   : > { %v1365_v2 = vadd.f32 %v1364_v1, %v1363_v0  ;;  %v1013_v40 = vadd.f32 %v1012_v38, %v1011_v34 }
 0x118   : > { %v1366_v3 = vrot.slane %v1365_v2, 4  ;;  %v1014_v41 = vrot.slane %v1013_v40, 1 }
 0x11a   : > { %v1367_v4 = vadd.f32 %v1366_v3, %v1365_v2  ;;  %v1015_v42 = vadd.f32 %v1014_v41, %v1013_v40 }
 0x11c   : > { %v1368_v5 = vrot.slane %v1367_v4, 2 }
 0x11e   : > { %v1369_v6 = vadd.f32 %v1368_v5, %v1367_v4 }
 0x120   : > { %v1370_v7 = vrot.slane %v1369_v6, 1 }
 0x122   : > { %v1371_v9 = vadd.f32 %v1370_v7, %v1369_v6 }
 0x17b   : > { %v831_v55 = vpop.permute.xlu0 %830 }
 0x17c   : > { %836 = vxpose.xlu1.b32.start [1/2] (short) (narrow) %v831_v55, 64 }
 0x17f   : > { %v833_v57 = vpop.permute.xlu0 %832 }
 0x180   : > { %837 = vxpose.xlu1.b32.end [2/2] (short) (narrow) %v833_v57, 64 }
 0x183   : > { %v1189_v62 = vpop.permute.xlu0 %1188 }
 0x184   : > { %1194 = vxpose.xlu0.b32.start [1/2] (short) (narrow) %v1189_v62, 64 }
 0x1b6   : > { %1190 = vrot.lane.b32.xlu1 %v3006_v63, %s2774_s22 }
 0x1ba   : > { %1452 = vrot.lane.b32.xlu1 %v1371_v9, %s2774_s22 }
 0x1f8   : > { %v852_v10 = vpop.trf.xlu1 }
 0x1f9   : > { %2520 = vmatprep.mubr.msk.f32.mxu1 %vm868_vm7, %v852_v10  ;;  %v805_v10 = vpop.f32.mrf.mxu0 }
 0x1fc   : > { %v853_v11 = vpop.trf.xlu1 }
 0x1fd   : > { %2521 = vmatmul.mubr.msk.f32.vlgmr.msra.gmra.mxu1 %vm868_vm7, %v853_v11 }
 0x200   : > { %v854_v12 = vpop.trf.xlu1 }
 0x201   : > { %2523 = vmatprep.mubr.msk.f32.mxu1 %vm868_vm7, %v854_v12  ;;  %v806_v12 = vadd.f32 %v805_v10, %v2988_v36 }
 0x204   : > { %v855_v13 = vpop.trf.xlu1 }
 0x205   : > { %2524 = vmatmul.mubr.msk.f32.gmra.mxu1 %vm868_vm7, %v855_v13  ;;  %v800_v13 = vadd.f32 %v3004_v54, %v2988_v36  ;;  %v1549_v36 = vld [vmem:[%s2899_s15 + $0x38] sm:$0xff]  ;;  %v1547_v54 = vld [vmem:[%s2899_s15 + $0x28] sm:$0xff] }
 0x208   : > { %v856_v14 = vpop.trf.xlu1 }
 0x209   : > { %2526 = vmatprep.mubr.msk.f32.mxu1 %vm868_vm7, %v856_v14  ;;  %v1546_v14 = vld [vmem:[%s2899_s15 + $0x20] sm:$0xff] }
 0x20c   : > { %v857_v15 = vpop.trf.xlu1 }
 0x20d   : > { %2527 = vmatmul.mubr.msk.f32.gmra.mxu1 %vm868_vm7, %v857_v15  ;;  %v1545_v15 = vld [vmem:[%s2899_s15 + $0x18] sm:$0xff] }
 0x210   : > { %v858_v16 = vpop.trf.xlu1 }
 0x211   : > { %2529 = vmatprep.mubr.msk.f32.mxu1 %vm868_vm7, %v858_v16  ;;  %v1544_v16 = vld [vmem:[%s2899_s15 + $0x10] sm:$0xff] }
 0x214   : > { %v859_v17 = vpop.trf.xlu1 }
 0x215   : > { %2530 = vmatmul.mubr.msk.f32.gmra.mxu1 %vm868_vm7, %v859_v17  ;;  %v1543_v17 = vld [vmem:[%s2899_s15 + $0x8] sm:$0xff] }
 0x216   : > { %2548 = vmatprep.mubr.msk.f32.mxu1 %vm706_vm1, %v2992_v47 }
 0x228   : > { %v1191_v18 = vpop.permute.xlu1 %1190 }
 0x229   : > { %1195 = vxpose.xlu0.b32.end [2/2] (short) (narrow) %v1191_v18, 64  ;;  %v1542_v18 = vld [vmem:[%s2899_s15] sm:$0xff] }
 0x26a   : > { %1096 = vrot.lane.b32.xlu0 %v1015_v42, %s2774_s22 }
 0x2a1   : > { %v1210_v43 = vpop.trf.xlu0 }
 0x2a5   : > { %v1211_v44 = vpop.trf.xlu0 }
 0x2a9   : > { %v1212_v45 = vpop.trf.xlu0 }
 0x2ad   : > { %v1213_v46 = vpop.trf.xlu0 }
 0x2b1   : > { %v1214_v49 = vpop.trf.xlu0 }
 0x2b5   : > { %v1215_v55 = vpop.trf.xlu0 }
 0x2b9   : > { %v1216_v58 = vpop.trf.xlu0 }
 0x2bd   : > { %v2522_v48 = vpop.f32.mrf.mxu1  ;;  %v1217_v62 = vpop.trf.xlu0 }
 0x2bf   : > { %v959_v51 = vpop.f32.mrf.mxu1 }
 0x2c0   : > { %v998_v11 = vmul.f32 %v959_v51, %v3080_v39 }
 0x2c5   : > { %v2525_v52 = vpop.f32.mrf.mxu1 }
 0x2c6   : > { %v1001_v7 = vmul.f32 %v2525_v52, %v3059_v33 }
 0x2c7   : > { %v969_v56 = vpop.f32.mrf.mxu1 }
 0x2c8   : > { %v1000_v9 = vmul.f32 %v969_v56, %v3066_v35 }
 0x2cd   : > { %v2528_v57 = vpop.f32.mrf.mxu1 }
 0x2ce   : > { %v1003_v2 = vmul.f32 %v2528_v57, %v3045_v29 }
 0x2cf   : > { %v979_v59 = vpop.f32.mrf.mxu1 }
 0x2d0   : > { %v1002_v3 = vmul.f32 %v979_v59, %v3052_v31 }
 0x2d5   : > { %v2531_v60 = vpop.f32.mrf.mxu1 }
 0x2d6   : > { %v1005_v61 = vmul.f32 %v2531_v60, %v3032_v25 }
 0x2d7   : > { %v989_v0 = vpop.f32.mrf.mxu1 }
 0x2d8   : > { %v1004_v1 = vmul.f32 %v989_v0, %v3038_v28  ;;  %2532 = vmatprep.subr.mxu1 %v1005_v61  ;;  %v1453_v0 = vpop.permute.xlu1 %1452 }
 0x2d9   : > { %2533 = vmatpush3.msra.mxu1 %v1005_v61 }
 0x2da   : > { %2534 = vmatprep.subr.mxu1 %v1004_v1 }
 0x2db   : > { %2535 = vmatpush3.msra.mxu1 %v1004_v1 }
 0x2dc   : > { %2536 = vmatprep.subr.mxu1 %v1003_v2  ;;  %v1097_v4 = vpop.permute.xlu0 %1096 }
 0x2dd   : > { %v1099_v5 = vmul.f32 %v1097_v4, %v2992_v47  ;;  %v1100_v6 = vmul.f32 %v1097_v4, %v2996_v50  ;;  %2537 = vmatpush3.msra.mxu1 %v1003_v2  ;;  %v999_v47 = vmul.f32 %v2522_v48, %v3073_v37  ;;  %v1455_v2 = vmul.f32 %v1453_v0, %v3000_v53 }
 0x2de   : > { %2538 = vmatprep.subr.mxu1 %v1002_v3 }
 0x2df   : > { %2539 = vmatpush3.msra.mxu1 %v1002_v3  ;;  %2567 = vmatprep.mubr.msk.f32.mxu0 %vm706_vm1, %v1099_v5 }
 0x2e0   : > { %2540 = vmatprep.subr.mxu1 %v1001_v7  ;;  %2568 = vmatmul.mubr.msk.f32.vlgmr.msra.gmra.mxu0 %vm706_vm1, %v1100_v6 }
 0x2e1   : > { %2541 = vmatpush3.msra.mxu1 %v1001_v7  ;;  %2602 = vmatprep.mubr.msk.f32.mxu0 %vm706_vm1, %v3000_v53  ;;  %v1456_v53 = vmul.f32 %v1453_v0, %v3006_v63  ;;  %v1881_v0 = vld [vmem:[%s2922_s4 + $0x78] sm:$0xff] }
 0x2e2   : > { %2542 = vmatprep.subr.mxu1 %v1000_v9 }
 0x2e3   : > { %2543 = vmatpush3.msra.mxu1 %v1000_v9 }
 0x2e4   : > { %2544 = vmatprep.subr.mxu1 %v999_v47 }
 0x2e5   : > { %2545 = vmatpush3.msra.mxu1 %v999_v47 }
 0x2e6   : > { %2546 = vmatprep.subr.mxu1 %v998_v11 }
 0x2e7   : > { %2547 = vmatpush3.msra.mxu1 %v998_v11 }
 0x2e8   : > { %2549 = vmatmul.mubr.msk.f32.vlgmr.msra.gmra.mxu1 %vm706_vm1, %v2996_v50  ;;  %2570 = vmatprep.subr.mxu1 %v806_v12  ;;  %v1548_v50 = vld [vmem:[%s2899_s15 + $0x30] sm:$0xff] }
 0x2e9   : > { %2571 = vmatpush3.msra.mxu1 %v806_v12  ;;  %2574 = vmatprep.mubr.msk.f32.mxu1 %vm868_vm7, %v1210_v43 }
 0x2ea   : > { %2572 = vmatprep.subr.mxu1 %v800_v13 }
 0x2eb   : > { %2573 = vmatpush3.msra.mxu1 %v800_v13 }
 0x2ec   : > { %2575 = vmatmul.mubr.msk.f32.vlgmr.msra.gmra.mxu1 %vm868_vm7, %v1211_v44  ;;  %2624 = vmatprep.subr.mxu1 %v1549_v36 }
 0x2ed   : > { %2577 = vmatprep.mubr.msk.f32.mxu1 %vm868_vm7, %v1212_v45  ;;  %2625 = vmatpush3.msra.mxu1 %v1549_v36 }
 0x2ee   : > { %2626 = vmatprep.subr.mxu1 %v1548_v50 }
 0x2ef   : > { %2627 = vmatpush3.msra.mxu1 %v1548_v50 }
 0x2f0   : > { %2578 = vmatmul.mubr.msk.f32.gmra.mxu1 %vm868_vm7, %v1213_v46  ;;  %2628 = vmatprep.subr.mxu1 %v1547_v54 }
 0x2f1   : > { %2580 = vmatprep.mubr.msk.f32.mxu1 %vm868_vm7, %v1214_v49  ;;  %2629 = vmatpush3.msra.mxu1 %v1547_v54  ;;  %v1744_v54 = vld [vmem:[%s2912_s26 + $0x78] sm:$0xff] }
 0x2f2   : > { %2630 = vmatprep.subr.mxu1 %v1546_v14 }
 0x2f3   : > { %2631 = vmatpush3.msra.mxu1 %v1546_v14  ;;  %v1743_v14 = vld [vmem:[%s2912_s26 + $0x70] sm:$0xff] }
 0x2f4   : > { %2581 = vmatmul.mubr.msk.f32.gmra.mxu1 %vm868_vm7, %v1215_v55  ;;  %2632 = vmatprep.subr.mxu1 %v1545_v15 }
 0x2f5   : > { %2583 = vmatprep.mubr.msk.f32.mxu1 %vm868_vm7, %v1216_v58  ;;  %2633 = vmatpush3.msra.mxu1 %v1545_v15  ;;  %v1742_v15 = vld [vmem:[%s2912_s26 + $0x68] sm:$0xff] }
 0x2f6   : > { %2634 = vmatprep.subr.mxu1 %v1544_v16 }
 0x2f7   : > { %2635 = vmatpush3.msra.mxu1 %v1544_v16  ;;  %v1741_v16 = vld [vmem:[%s2912_s26 + $0x60] sm:$0xff] }
 0x2f8   : > { %2584 = vmatmul.mubr.msk.f32.gmra.mxu1 %vm868_vm7, %v1217_v62  ;;  %2636 = vmatprep.subr.mxu1 %v1543_v17 }
 0x2f9   : > { %2637 = vmatpush3.msra.mxu1 %v1543_v17  ;;  %v1740_v17 = vld [vmem:[%s2912_s26 + $0x58] sm:$0xff] }
 0x2fa   : > { %2638 = vmatprep.subr.mxu1 %v1542_v18 }
 0x2fb   : > { %2639 = vmatpush3.msra.mxu1 %v1542_v18  ;;  %v1739_v18 = vld [vmem:[%s2912_s26 + $0x50] sm:$0xff] }
 0x3a0   : > { %v2569_v19 = vpop.f32.mrf.mxu0 }
 0x3a1   : > { %v1179_v20 = vadd.f32 1e-06, %v2569_v19  ;;  %v1738_v19 = vld [vmem:[%s2912_s26 + $0x48] sm:$0xff] }
 0x3a2   : > { %v1173_v26 = vpop.f32.mrf.mxu0 }
 0x3a3   : > { %v1174_v30 = vadd.f32 1e-06, %v1173_v26  ;;  %2689 = vrcp.f32 %v1179_v20  ;;  %v1737_v20 = vld [vmem:[%s2912_s26 + $0x40] sm:$0xff]  ;;  %v1736_v26 = vld [vmem:[%s2912_s26 + $0x38] sm:$0xff] }
 0x3a5   : > { %2691 = vrcp.f32 %v1174_v30  ;;  %v1735_v30 = vld [vmem:[%s2912_s26 + $0x30] sm:$0xff] }
 0x3a8   : > { %v2550_v34 = vpop.f32.mrf.mxu1 }
 0x3aa   : > { %v1086_v38 = vpop.f32.mrf.mxu1 }
 0x3ac   : > { %v2576_v40 = vpop.f32.mrf.mxu1 }
 0x3ad   : > { %v1356_v62 = vmul.f32 %v2576_v40, %v3073_v37  ;;  %v1732_v40 = vld [vmem:[%s2912_s26 + $0x18] sm:$0xff] }
 0x3ae   : > { %v1316_v41 = vpop.f32.mrf.mxu1 }
 0x3af   : > { %v1355_v1 = vmul.f32 %v1316_v41, %v3080_v39  ;;  %v1731_v41 = vld [vmem:[%s2912_s26 + $0x10] sm:$0xff] }
 0x3b0   : > { %v2579_v42 = vpop.f32.mrf.mxu1  ;;  %v2690_v43 = vpop.eup %2689 }
 0x3b1   : > { %v1185_v48 = vmul.f32 %v2690_v43, %v2550_v34  ;;  %v1358_v60 = vmul.f32 %v2579_v42, %v3059_v33  ;;  %v1734_v34 = vld [vmem:[%s2912_s26 + $0x28] sm:$0xff]  ;;  %v1729_v43 = vld [vmem:[%s2912_s26] sm:$0xff] }
 0x3b2   : > { %v2692_v44 = vpop.eup %2691  ;;  %v1326_v45 = vpop.f32.mrf.mxu1  ;;  %v1730_v42 = vld [vmem:[%s2912_s26 + $0x8] sm:$0xff] }
 0x3b3   : > { %v1184_v46 = vmul.f32 %v2692_v44, %v1086_v38  ;;  %v1357_v61 = vmul.f32 %v1326_v45, %v3066_v35  ;;  %v1733_v38 = vld [vmem:[%s2912_s26 + $0x20] sm:$0xff] }
 0x3b4   : > { %v2582_v49 = vpop.f32.mrf.mxu1 }
 0x3b5   : > { %2640 = vmatprep.mubr.msk.f32.mxu1 %vm706_vm1, %v1184_v46  ;;  %v1360_v58 = vmul.f32 %v2582_v49, %v3045_v29 }
 0x3b6   : > { %v1336_v51 = vpop.f32.mrf.mxu1  ;;  %2641 = vmatmul.mubr.msk.f32.vlgmr.msra.gmra.mxu1 %vm706_vm1, %v1185_v48 }
 0x3b7   : > { %v1359_v59 = vmul.f32 %v1336_v51, %v3052_v31 }
 0x3b8   : > { %v2585_v52 = vpop.f32.mrf.mxu1 }
 0x3b9   : > { %v1362_v55 = vmul.f32 %v2585_v52, %v3032_v25 }
 0x3ba   : > { %v1346_v56 = vpop.f32.mrf.mxu1 }
 0x3bb   : > { %v1361_v57 = vmul.f32 %v1346_v56, %v3038_v28  ;;  %2586 = vmatprep.subr.mxu0 %v1362_v55 }
 0x3bc   : > { %2587 = vmatpush3.msra.mxu0 %v1362_v55 }
 0x3bd   : > { %2588 = vmatprep.subr.mxu0 %v1361_v57 }
 0x3be   : > { %2589 = vmatpush3.msra.mxu0 %v1361_v57 }
 0x3bf   : > { %2590 = vmatprep.subr.mxu0 %v1360_v58 }
 0x3c0   : > { %2591 = vmatpush3.msra.mxu0 %v1360_v58 }
 0x3c1   : > { %2592 = vmatprep.subr.mxu0 %v1359_v59 }
 0x3c2   : > { %2593 = vmatpush3.msra.mxu0 %v1359_v59 }
 0x3c3   : > { %2594 = vmatprep.subr.mxu0 %v1358_v60 }
 0x3c4   : > { %2595 = vmatpush3.msra.mxu0 %v1358_v60 }
 0x3c5   : > { %2596 = vmatprep.subr.mxu0 %v1357_v61 }
 0x3c6   : > { %2597 = vmatpush3.msra.mxu0 %v1357_v61 }
 0x3c7   : > { %2598 = vmatprep.subr.mxu0 %v1356_v62 }
 0x3c8   : > { %2599 = vmatpush3.msra.mxu0 %v1356_v62  ;;  %v1897_v62 = vld [vmem:[%s2922_s4 + $0xf8] sm:$0xff] }
 0x3c9   : > { %2600 = vmatprep.subr.mxu0 %v1355_v1  ;;  %2472 = vmatprep.subr.mxu1 %v1897_v62 }
 0x3ca   : > { %2601 = vmatpush3.msra.mxu0 %v1355_v1  ;;  %v1896_v1 = vld [vmem:[%s2922_s4 + $0xf0] sm:$0xff]  ;;  %2473 = vmatpush3.msra.mxu1 %v1881_v0 }
 0x3cb   : > { %2603 = vmatmul.mubr.msk.f32.vlgmr.msra.gmra.mxu0 %vm706_vm1, %v3006_v63  ;;  %2605 = vmatprep.subr.mxu0 %v3032_v25 }
 0x3cc   : > { %2606 = vmatpush3.msra.mxu0 %v3032_v25  ;;  %2621 = vmatprep.mubr.msk.f32.mxu0 %vm706_vm1, %v1455_v2  ;;  %v1880_v2 = vld [vmem:[%s2922_s4 + $0x70] sm:$0xff] }
 0x3cd   : > { %2607 = vmatprep.subr.mxu0 %v3038_v28  ;;  %2474 = vmatprep.subr.mxu1 %v1896_v1 }
 0x3ce   : > { %2608 = vmatpush3.msra.mxu0 %v3038_v28  ;;  %v3159_v28 = vld [vmem:[%s3399_s30] ss:$0 sm:$0xff]  ;;  %2475 = vmatpush3.msra.mxu1 %v1880_v2 }
 0x3cf   : > { %2609 = vmatprep.subr.mxu0 %v3045_v29 }
 0x3d0   : > { %2610 = vmatpush3.msra.mxu0 %v3045_v29 }
 0x3d1   : > { %2611 = vmatprep.subr.mxu0 %v3052_v31 }
 0x3d2   : > { %2612 = vmatpush3.msra.mxu0 %v3052_v31 }
 0x3d3   : > { %2613 = vmatprep.subr.mxu0 %v3059_v33 }
 0x3d4   : > { %2614 = vmatpush3.msra.mxu0 %v3059_v33 }
 0x3d5   : > { %2615 = vmatprep.subr.mxu0 %v3066_v35 }
 0x3d6   : > { %2616 = vmatpush3.msra.mxu0 %v3066_v35 }
 0x3d7   : > { %2617 = vmatprep.subr.mxu0 %v3073_v37 }
 0x3d8   : > { %2618 = vmatpush3.msra.mxu0 %v3073_v37 }
 0x3d9   : > { %2619 = vmatprep.subr.mxu0 %v3080_v39 }
 0x3da   : > { %2620 = vmatpush3.msra.mxu0 %v3080_v39 }
 0x3db   : > { %2622 = vmatmul.mubr.msk.f32.vlgmr.msra.gmra.mxu0 %vm706_vm1, %v1456_v53  ;;  %1785 = vmatprep.subr.mxu0 %v1744_v54  ;;  %v1895_v53 = vld [vmem:[%s2922_s4 + $0xe8] sm:$0xff] }
 0x3dc   : > { %1833 = vmatprep.mubr.f32.mxu0 %v2773_v8  ;;  %1786 = vmatpush1.msra.mxu0 %v1743_v14  ;;  %v1871_v54 = vld [vmem:[%s2922_s4 + $0x28] sm:$0xff]  ;;  %v1886_v14 = vld [vmem:[%s2922_s4 + $0xa0] sm:$0xff] }
 0x3dd   : > { %1787 = vmatprep.subr.mxu0 %v1742_v15  ;;  %2476 = vmatprep.subr.mxu1 %v1895_v53  ;;  %v1870_v15 = vld [vmem:[%s2922_s4 + $0x20] sm:$0xff] }
 0x3de   : > { %1788 = vmatpush1.msra.mxu0 %v1741_v16  ;;  %v1885_v16 = vld [vmem:[%s2922_s4 + $0x98] sm:$0xff] }
 0x3df   : > { %1789 = vmatprep.subr.mxu0 %v1740_v17  ;;  %v1869_v17 = vld [vmem:[%s2922_s4 + $0x18] sm:$0xff] }
 0x3e0   : > { %1790 = vmatpush1.msra.mxu0 %v1739_v18  ;;  %v1884_v18 = vld [vmem:[%s2922_s4 + $0x90] sm:$0xff] }
 0x3e1   : > { %1791 = vmatprep.subr.mxu0 %v1738_v19  ;;  %v1868_v19 = vld [vmem:[%s2922_s4 + $0x10] sm:$0xff] }
 0x3e2   : > { %1792 = vmatpush1.msra.mxu0 %v1737_v20  ;;  %v1883_v20 = vld [vmem:[%s2922_s4 + $0x88] sm:$0xff] }
 0x3e3   : > { %1793 = vmatprep.subr.mxu0 %v1736_v26  ;;  %v1867_v26 = vld [vmem:[%s2922_s4 + $0x8] sm:$0xff] }
 0x3e4   : > { %1794 = vmatpush1.msra.mxu0 %v1735_v30  ;;  %v1882_v30 = vld [vmem:[%s2922_s4 + $0x80] sm:$0xff] }
 0x3e5   : > { %1795 = vmatprep.subr.mxu0 %v1734_v34  ;;  %v1866_v34 = vld [vmem:[%s2922_s4] sm:$0xff] }
 0x3e6   : > { %1796 = vmatpush1.msra.mxu0 %v1733_v38 }
 0x3e7   : > { %1797 = vmatprep.subr.mxu0 %v1732_v40 }
 0x3e8   : > { %1798 = vmatpush1.msra.mxu0 %v1731_v41 }
 0x3e9   : > { %1799 = vmatprep.subr.mxu0 %v1730_v42 }
 0x3ea   : > { %1800 = vmatpush1.msra.mxu0 %v1729_v43 }
 0x476   : > { %v2642_v25 = vpop.f32.mrf.mxu1 }
 0x477   : > { %v1641_v31 = vadd.f32 %v2642_v25, %v3159_v28  ;;  %v3221_v25 = vld [vmem:[%s630_s13] sm:$0x3] }
 0x478   : > { %v1635_v29 = vpop.f32.mrf.mxu1 }
 0x479   : > { %v1636_v63 = vadd.f32 %v3159_v28, %v1635_v29  ;;  %v3166_v37 = vadd.f32 %v1641_v31, %v2963_v22  ;;  %v1894_v29 = vld [vmem:[%s2922_s4 + $0xe0] sm:$0xff] }
 0x47a   : > { %v3230_v31 = vld [vmem:[%s634_s1] sm:$0x3] }
 0x47b   : > { %v1656_v33 = vadd.f32 %v1636_v63, %v2958_v21  ;;  %v1663_v39 = vsel %vm706_vm1, %v3166_v37, 0.0  ;;  %v1878_v63 = vld [vmem:[%s2922_s4 + $0x60] sm:$0xff] }
 0x47d   : > { %v1660_v35 = vsel %vm706_vm1, %v1656_v33, 0.0 }
 0x47e   : > { %1661 = vadd.xlane.f32.xlu1 %v1660_v35  ;;  %v1893_v35 = vld [vmem:[%s2922_s4 + $0xd8] sm:$0xff] }
 0x482   : > { %1664 = vadd.xlane.f32.xlu1 %v1663_v39  ;;  %v1877_v39 = vld [vmem:[%s2922_s4 + $0x58] sm:$0xff] }
 0x48b   : > { %v2604_v3 = vpop.f32.mrf.mxu0 }
 0x48d   : > { %v1442_v4 = vpop.f32.mrf.mxu0 }
 0x49b   : > { %v2623_v5 = vpop.f32.mrf.mxu0 }
 0x49c   : > { %v1535_v6 = vadd.f32 1e-06, %v2623_v5  ;;  %v1892_v5 = vld [vmem:[%s2922_s4 + $0xd0] sm:$0xff] }
 0x49d   : > { %v1529_v7 = vpop.f32.mrf.mxu0 }
 0x49e   : > { %v1530_v9 = vadd.f32 1e-06, %v1529_v7  ;;  %2693 = vrcp.f32 %v1535_v6  ;;  %v1876_v6 = vld [vmem:[%s2922_s4 + $0x50] sm:$0xff] }
 0x4a0   : > { %2695 = vrcp.f32 %v1530_v9  ;;  %v1891_v9 = vld [vmem:[%s2922_s4 + $0xc8] sm:$0xff] }
 0x4ab   : > { %v2694_v21 = vpop.eup %2693 }
 0x4ac   : > { %v1541_v10 = vmul.f32 %v2694_v21, %v2604_v3  ;;  %v1875_v21 = vld [vmem:[%s2922_s4 + $0x48] sm:$0xff] }
 0x4ad   : > { %v2696_v47 = vpop.eup %2695 }
 0x4ae   : > { %v1540_v22 = vmul.f32 %v2696_v47, %v1442_v4  ;;  %v3242_v4 = vrot.slane %v3230_v31, %v2977_v27 }
 0x4b0   : > { %2643 = vmatprep.mubr.msk.f32.mxu1 %vm706_vm1, %v1540_v22  ;;  %v1890_v22 = vld [vmem:[%s2922_s4 + $0xc0] sm:$0xff] }
 0x4b1   : > { %2644 = vmatmul.mubr.msk.f32.gmra.mxu1 %vm706_vm1, %v1541_v10  ;;  %v1874_v10 = vld [vmem:[%s2922_s4 + $0x40] sm:$0xff] }
 0x507   : > { %v1662_v11 = vpop.xlane.xlu1 %1661 }
 0x508   : > { %v1673_v12 = vmul.f32 0.015625, %v1662_v11  ;;  %v1889_v11 = vld [vmem:[%s2922_s4 + $0xb8] sm:$0xff] }
 0x50a   : > { %v3172_v13 = vsub.f32 %v1656_v33, %v1673_v12  ;;  %v3235_v33 = vrot.slane %v3221_v25, %v2977_v27  ;;  %v1873_v12 = vld [vmem:[%s2922_s4 + $0x38] sm:$0xff] }
 0x50b   : > { %v1665_v44 = vpop.xlane.xlu1 %1664 }
 0x50c   : > { %v1681_v36 = vmul.f32 %v3172_v13, %v3172_v13  ;;  %v1674_v48 = vmul.f32 0.015625, %v1665_v44 }
 0x50e   : > { %v1685_v50 = vsel %vm706_vm1, %v1681_v36, 0.0  ;;  %v3199_v55 = vsub.f32 %v3166_v37, %v1674_v48  ;;  %v1872_v36 = vld [vmem:[%s2922_s4 + $0x30] sm:$0xff] }
 0x50f   : > { %1686 = vadd.xlane.f32.xlu0 %v1685_v50  ;;  %v1887_v50 = vld [vmem:[%s2922_s4 + $0xa8] sm:$0xff] }
 0x571   : > { %v2645_v45 = vpop.f32.mrf.mxu1 }
 0x572   : > { %v1651_v49 = vadd.f32 %v2645_v45, %v3159_v28 }
 0x573   : > { %v1645_v46 = vpop.f32.mrf.mxu1 }
 0x574   : > { %v1646_v51 = vadd.f32 %v3159_v28, %v1645_v46  ;;  %v3204_v57 = vadd.f32 %v1651_v49, %v2973_v24  ;;  %v1879_v28 = vld [vmem:[%s2922_s4 + $0x68] sm:$0xff] }
 0x575   : > { %2477 = vmatpush3.msra.mxu1 %v1879_v28 }
 0x576   : > { %v3196_v52 = vadd.f32 %v1646_v51, %v2968_v23  ;;  %v1669_v58 = vsel %vm706_vm1, %v3204_v57, 0.0  ;;  %v1682_v23 = vmul.f32 %v3199_v55, %v3199_v55  ;;  %2478 = vmatprep.subr.mxu1 %v1894_v29 }
 0x577   : > { %2479 = vmatpush3.msra.mxu1 %v1878_v63 }
 0x578   : > { %v1666_v56 = vsel %vm706_vm1, %v3196_v52, 0.0  ;;  %v1688_v59 = vsel %vm706_vm1, %v1682_v23, 0.0  ;;  %2480 = vmatprep.subr.mxu1 %v1893_v35 }
 0x579   : > { %1667 = vadd.xlane.f32.xlu1 %v1666_v56  ;;  %2481 = vmatpush3.msra.mxu1 %v1877_v39 }
 0x57a   : > { %2482 = vmatprep.subr.mxu1 %v1892_v5 }
 0x57b   : > { %2483 = vmatpush3.msra.mxu1 %v1876_v6 }
 0x57c   : > { %2484 = vmatprep.subr.mxu1 %v1891_v9 }
 0x57d   : > { %1670 = vadd.xlane.f32.xlu1 %v1669_v58  ;;  %2485 = vmatpush3.msra.mxu1 %v1875_v21 }
 0x57e   : > { %2486 = vmatprep.subr.mxu1 %v1890_v22 }
 0x57f   : > { %2487 = vmatpush3.msra.mxu1 %v1874_v10 }
 0x580   : > { %2488 = vmatprep.subr.mxu1 %v1889_v11 }
 0x581   : > { %1689 = vadd.xlane.f32.xlu1 %v1688_v59  ;;  %2489 = vmatpush3.msra.mxu1 %v1873_v12 }
 0x598   : > { %v1687_v60 = vpop.xlane.xlu0 %1686 }
 0x599   : > { %v1697_v61 = vmul.f32 0.015625, %v1687_v60 }
 0x59b   : > { %v1701_v24 = vadd.f32 1e-05, %v1697_v61 }
 0x59d   : > { %2697 = vrsqrt.f32 %v1701_v24 }
 0x5aa   : > { %v2698_v37 = vpop.eup %2697 }
 0x5ab   : > { %v1709_v3 = vmul.f32 %v2698_v37, %v3172_v13  ;;  %v1888_v13 = vld [vmem:[%s2922_s4 + $0xb0] sm:$0xff] }
 0x5ac   : > { %2490 = vmatprep.subr.mxu1 %v1888_v13 }
 0x5ad   : > { %v1717_v7 = vmul.f32 %v3235_v33, %v1709_v3  ;;  %2491 = vmatpush3.msra.mxu1 %v1872_v36 }
 0x5ae   : > { %2492 = vmatprep.subr.mxu1 %v1887_v50 }
 0x5af   : > { %v3250_v47 = vadd.f32 %v3242_v4, %v1717_v7  ;;  %2493 = vmatpush3.msra.mxu1 %v1871_v54 }
 0x5b0   : > { %2494 = vmatprep.subr.mxu1 %v1886_v14 }
 0x5b1   : > { %2383 = vmatmul.mubr.msk.f32.vlgmr.msra.gmra.mxu0 %vm706_vm1, %v3250_v47  ;;  %2495 = vmatpush3.msra.mxu1 %v1870_v15 }
 0x5b2   : > { %1839 = vmatprep.mubr.f32.mxu0 %v2773_v8  ;;  %2496 = vmatprep.subr.mxu1 %v1885_v16 }
 0x5b3   : > { %2497 = vmatpush3.msra.mxu1 %v1869_v17 }
 0x5b4   : > { %2498 = vmatprep.subr.mxu1 %v1884_v18 }
 0x5b5   : > { %2499 = vmatpush3.msra.mxu1 %v1868_v19 }
 0x5b6   : > { %2500 = vmatprep.subr.mxu1 %v1883_v20 }
 0x5b7   : > { %2501 = vmatpush3.msra.mxu1 %v1867_v26 }
 0x5b8   : > { %2502 = vmatprep.subr.mxu1 %v1882_v30 }
 0x5b9   : > { %2503 = vmatpush3.msra.mxu1 %v1866_v34 }
 0x602   : > { %v1668_v38 = vpop.xlane.xlu1 %1667 }
 0x603   : > { %v1675_v40 = vmul.f32 0.015625, %v1668_v38 }
 0x605   : > { %v1679_v41 = vsub.f32 %v3196_v52, %v1675_v40 }
 0x606   : > { %v1671_v42 = vpop.xlane.xlu1 %1670 }
 0x607   : > { %v1676_v43 = vmul.f32 0.015625, %v1671_v42  ;;  %v1683_v44 = vmul.f32 %v1679_v41, %v1679_v41 }
 0x609   : > { %v1680_v45 = vsub.f32 %v3204_v57, %v1676_v43  ;;  %v1691_v46 = vsel %vm706_vm1, %v1683_v44, 0.0  ;;  %v1745_v57 = vld [vmem:[%s643_s17] sm:$0x3] }
 0x60a   : > { %1692 = vadd.xlane.f32.xlu1 %v1691_v46  ;;  %v1690_v48 = vpop.xlane.xlu1 %1689  ;;  %v1750_v61 = vrot.slane %v1745_v57, %v2977_v27  ;;  %v1754_v24 = vrot.slane %v1745_v57, %v2985_v32 }
 0x60b   : > { %v1698_v49 = vmul.f32 0.015625, %v1690_v48  ;;  %v1684_v51 = vmul.f32 %v1680_v45, %v1680_v45 }
 0x60d   : > { %v1702_v56 = vadd.f32 1e-05, %v1698_v49  ;;  %v1694_v58 = vsel %vm706_vm1, %v1684_v51, 0.0 }
 0x60e   : > { %1695 = vadd.xlane.f32.xlu1 %v1694_v58 }
 0x60f   : > { %2699 = vrsqrt.f32 %v1702_v56 }
 0x61c   : > { %v2700_v23 = vpop.eup %2699 }
 0x61d   : > { %v1710_v52 = vmul.f32 %v2700_v23, %v3199_v55 }
 0x61f   : > { %v1718_v59 = vmul.f32 %v3235_v33, %v1710_v52 }
 0x621   : > { %v3280_v60 = vadd.f32 %v3242_v4, %v1718_v59 }
 0x623   : > { %2384 = vmatmul.mubr.msk.f32.gmra.mxu0 %vm706_vm1, %v3280_v60 }
 0x624   : > { %1845 = vmatprep.mubr.f32.mxu0 %v2773_v8 }
 0x671   : > { %v1835_v55 = vpop.f32.mrf.mxu0 }
 0x672   : > { %v1836_v62 = vadd.f32 %v1835_v55, %v1750_v61 }
 0x673   : > { %v1837_v0 = vpop.f32.mrf.mxu0 }
 0x674   : > { %v1838_v1 = vadd.f32 %v1837_v0, %v1754_v24  ;;  %v1858_v53 = vmax.f32 %v1836_v62, 0.0 }
 0x676   : > { %v1859_v2 = vmax.f32 %v1838_v1, 0.0 }
 0x678   : > { %1969 = vmatprep.mubr.f32.mxu1 %v1859_v2 }
 0x679   : > { %1970 = vmatmul.mubr.f32.vlgmr.msra.gmra.mxu1 %v1858_v53 }
 0x693   : > { %v1693_v28 = vpop.xlane.xlu1 %1692 }
 0x694   : > { %v1699_v29 = vmul.f32 0.015625, %v1693_v28 }
 0x696   : > { %v1703_v63 = vadd.f32 1e-05, %v1699_v29 }
 0x697   : > { %v1696_v35 = vpop.xlane.xlu1 %1695 }
 0x698   : > { %2701 = vrsqrt.f32 %v1703_v63  ;;  %v1700_v37 = vmul.f32 0.015625, %v1696_v35 }
 0x69a   : > { %v1704_v39 = vadd.f32 1e-05, %v1700_v37 }
 0x69c   : > { %2703 = vrsqrt.f32 %v1704_v39 }
 0x6a5   : > { %v2702_v3 = vpop.eup %2701 }
 0x6a6   : > { %v1711_v27 = vmul.f32 %v2702_v3, %v1679_v41 }
 0x6a8   : > { %v1719_v5 = vmul.f32 %v3235_v33, %v1711_v27 }
 0x6a9   : > { %v2704_v6 = vpop.eup %2703 }
 0x6aa   : > { %v1727_v7 = vadd.f32 %v3242_v4, %v1719_v5  ;;  %v1712_v9 = vmul.f32 %v2704_v6, %v1680_v45  ;;  %v2049_v6 = vrot.slane %v3221_v25, %v2985_v32 }
 0x6ac   : > { %2385 = vmatmul.mubr.msk.f32.gmra.mxu0 %vm706_vm1, %v1727_v7  ;;  %v1720_v21 = vmul.f32 %v3235_v33, %v1712_v9  ;;  %v2387_v33 = vld [vmem:[%s651_s2] ss:$0 sm:$0xff]  ;;  %v2057_v9 = vrot.slane %v3230_v31, %v2985_v32 }
 0x6ad   : > { %1851 = vmatprep.mubr.f32.mxu0 %v2773_v8 }
 0x6ae   : > { %v1728_v22 = vadd.f32 %v3242_v4, %v1720_v21 }
 0x6b0   : > { %2386 = vmatmul.mubr.msk.f32.gmra.mxu0 %vm706_vm1, %v1728_v22 }
 0x6e3   : > { %v1841_v10 = vpop.f32.mrf.mxu0 }
 0x6e4   : > { %v1842_v11 = vadd.f32 %v1841_v10, %v1750_v61 }
 0x6e5   : > { %v1843_v12 = vpop.f32.mrf.mxu0 }
 0x6e6   : > { %v1844_v13 = vadd.f32 %v1843_v12, %v1754_v24  ;;  %v1860_v50 = vmax.f32 %v1842_v11, 0.0 }
 0x6e8   : > { %v1861_v36 = vmax.f32 %v1844_v13, 0.0 }
 0x6ea   : > { %1974 = vmatprep.mubr.f32.mxu1 %v1861_v36 }
 0x6eb   : > { %1975 = vmatmul.mubr.f32.gmra.mxu1 %v1860_v50 }
 0x739   : > { %v2504_v54 = vpop.f32.mrf.mxu1 }
 0x73b   : > { %v2505_v14 = vpop.f32.mrf.mxu1 }
 0x73c   : > { %v2506_v8 = vadd.f32 %v2505_v14, %v2504_v54 }
 0x73e   : > { %v1972_v15 = vadd.f32 %v2506_v8, %v2387_v33 }
 0x740   : > { %v1990_v4 = vadd.f32 %v1972_v15, %v3250_v47 }
 0x742   : > { %v1994_v16 = vsel %vm706_vm1, %v1990_v4, 0.0 }
 0x743   : > { %1995 = vadd.xlane.f32.xlu1 %v1994_v16 }
 0x76c   : > { %v1847_v17 = vpop.f32.mrf.mxu0 }
 0x76d   : > { %v1848_v18 = vadd.f32 %v1847_v17, %v1750_v61 }
 0x76e   : > { %v1849_v19 = vpop.f32.mrf.mxu0 }
 0x76f   : > { %v1850_v20 = vadd.f32 %v1849_v19, %v1754_v24  ;;  %v1862_v34 = vmax.f32 %v1848_v18, 0.0 }
 0x770   : > { %v1853_v26 = vpop.f32.mrf.mxu0 }
 0x771   : > { %v1863_v30 = vmax.f32 %v1850_v20, 0.0  ;;  %v1854_v38 = vadd.f32 %v1853_v26, %v1750_v61 }
 0x772   : > { %v1855_v40 = vpop.f32.mrf.mxu0 }
 0x773   : > { %v1856_v41 = vadd.f32 %v1855_v40, %v1754_v24  ;;  %1979 = vmatprep.mubr.f32.mxu1 %v1863_v30  ;;  %v1864_v43 = vmax.f32 %v1854_v38, 0.0 }
 0x774   : > { %1980 = vmatmul.mubr.f32.gmra.mxu1 %v1862_v34 }
 0x775   : > { %v1865_v42 = vmax.f32 %v1856_v41, 0.0 }
 0x777   : > { %1984 = vmatprep.mubr.f32.mxu1 %v1865_v42 }
 0x778   : > { %1985 = vmatmul.mubr.f32.gmra.mxu1 %v1864_v43 }
 0x7ab   : > { %v2507_v47 = vpop.f32.mrf.mxu1 }
 0x7ad   : > { %v2508_v44 = vpop.f32.mrf.mxu1 }
 0x7ae   : > { %v2509_v45 = vadd.f32 %v2508_v44, %v2507_v47 }
 0x7b0   : > { %v1977_v46 = vadd.f32 %v2509_v45, %v2387_v33 }
 0x7b2   : > { %v1991_v48 = vadd.f32 %v1977_v46, %v3280_v60 }
 0x7b4   : > { %v1997_v49 = vsel %vm706_vm1, %v1991_v48, 0.0 }
 0x7b5   : > { %1998 = vadd.xlane.f32.xlu1 %v1997_v49 }
 0x7cc   : > { %v1996_v51 = vpop.xlane.xlu1 %1995 }
 0x7cd   : > { %v2006_v56 = vmul.f32 0.015625, %v1996_v51 }
 0x7cf   : > { %v2010_v58 = vsub.f32 %v1990_v4, %v2006_v56 }
 0x7d1   : > { %v2014_v23 = vmul.f32 %v2010_v58, %v2010_v58 }
 0x7d3   : > { %v2018_v52 = vsel %vm706_vm1, %v2014_v23, 0.0 }
 0x7d4   : > { %2019 = vadd.xlane.f32.xlu0 %v2018_v52 }
 0x834   : > { %v2510_v59 = vpop.f32.mrf.mxu1 }
 0x836   : > { %v2511_v57 = vpop.f32.mrf.mxu1 }
 0x837   : > { %v2512_v61 = vadd.f32 %v2511_v57, %v2510_v59 }
 0x838   : > { %v2513_v24 = vpop.f32.mrf.mxu1 }
 0x839   : > { %v1982_v55 = vadd.f32 %v2512_v61, %v2387_v33 }
 0x83a   : > { %v2514_v62 = vpop.f32.mrf.mxu1 }
 0x83b   : > { %v2515_v0 = vadd.f32 %v2514_v62, %v2513_v24  ;;  %v1992_v1 = vadd.f32 %v1982_v55, %v1727_v7 }
 0x83d   : > { %v1987_v2 = vadd.f32 %v2515_v0, %v2387_v33  ;;  %v2000_v60 = vsel %vm706_vm1, %v1992_v1, 0.0 }
 0x83e   : > { %2001 = vadd.xlane.f32.xlu1 %v2000_v60  ;;  %v1999_v53 = vpop.xlane.xlu1 %1998 }
 0x83f   : > { %v2007_v28 = vmul.f32 0.015625, %v1999_v53  ;;  %v1993_v29 = vadd.f32 %v1987_v2, %v1728_v22 }
 0x841   : > { %v2011_v63 = vsub.f32 %v1991_v48, %v2007_v28  ;;  %v2003_v35 = vsel %vm706_vm1, %v1993_v29, 0.0 }
 0x842   : > { %2004 = vadd.xlane.f32.xlu1 %v2003_v35 }
 0x843   : > { %v2015_v37 = vmul.f32 %v2011_v63, %v2011_v63 }
 0x845   : > { %v2021_v39 = vsel %vm706_vm1, %v2015_v37, 0.0 }
 0x846   : > { %2022 = vadd.xlane.f32.xlu1 %v2021_v39 }
 0x85d   : > { %v2020_v3 = vpop.xlane.xlu0 %2019 }
 0x85e   : > { %v2030_v27 = vmul.f32 0.015625, %v2020_v3 }
 0x860   : > { %v2034_v5 = vadd.f32 1e-05, %v2030_v27 }
 0x862   : > { %2705 = vrsqrt.f32 %v2034_v5 }
 0x86f   : > { %v2706_v7 = vpop.eup %2705 }
 0x870   : > { %v2042_v21 = vmul.f32 %v2706_v7, %v2010_v58 }
 0x872   : > { %v2050_v22 = vmul.f32 %v2049_v6, %v2042_v21 }
 0x874   : > { %v2058_v10 = vadd.f32 %v2057_v9, %v2050_v22 }
 0x8c7   : > { %v2002_v11 = vpop.xlane.xlu1 %2001 }
 0x8c8   : > { %v2008_v12 = vmul.f32 0.015625, %v2002_v11 }
 0x8ca   : > { %v2012_v13 = vsub.f32 %v1992_v1, %v2008_v12 }
 0x8cb   : > { %v2005_v36 = vpop.xlane.xlu1 %2004 }
 0x8cc   : > { %v2009_v50 = vmul.f32 0.015625, %v2005_v36  ;;  %v2016_v54 = vmul.f32 %v2012_v13, %v2012_v13 }
 0x8ce   : > { %v2013_v33 = vsub.f32 %v1993_v29, %v2009_v50  ;;  %v2024_v14 = vsel %vm706_vm1, %v2016_v54, 0.0 }
 0x8cf   : > { %2025 = vadd.xlane.f32.xlu0 %v2024_v14  ;;  %v2023_v8 = vpop.xlane.xlu1 %2022 }
 0x8d0   : > { %v2031_v15 = vmul.f32 0.015625, %v2023_v8  ;;  %v2017_v25 = vmul.f32 %v2013_v33, %v2013_v33 }
 0x8d2   : > { %v2035_v4 = vadd.f32 1e-05, %v2031_v15  ;;  %v2027_v16 = vsel %vm706_vm1, %v2017_v25, 0.0 }
 0x8d3   : > { %2028 = vadd.xlane.f32.xlu1 %v2027_v16 }
 0x8d4   : > { %2707 = vrsqrt.f32 %v2035_v4 }
 0x8e1   : > { %v2708_v32 = vpop.eup %2707 }
 0x8e2   : > { %v2043_v31 = vmul.f32 %v2708_v32, %v2011_v63 }
 0x8e4   : > { %v2051_v17 = vmul.f32 %v2049_v6, %v2043_v31 }
 0x8e6   : > { %v2059_v18 = vadd.f32 %v2057_v9, %v2051_v17 }
 0x958   : > { %v2026_v19 = vpop.xlane.xlu0 %2025 }
 0x959   : > { %v2032_v20 = vmul.f32 0.015625, %v2026_v19 }
 0x95b   : > { %v2036_v26 = vadd.f32 1e-05, %v2032_v20 }
 0x95c   : > { %v2029_v30 = vpop.xlane.xlu1 %2028 }
 0x95d   : > { %2709 = vrsqrt.f32 %v2036_v26  ;;  %v2033_v34 = vmul.f32 0.015625, %v2029_v30 }
 0x95f   : > { %v2037_v38 = vadd.f32 1e-05, %v2033_v34 }
 0x961   : > { %2711 = vrsqrt.f32 %v2037_v38 }
 0x96a   : > { %v2710_v40 = vpop.eup %2709 }
 0x96b   : > { %v2044_v41 = vmul.f32 %v2710_v40, %v2012_v13 }
 0x96d   : > { %v2052_v42 = vmul.f32 %v2049_v6, %v2044_v41 }
 0x96e   : > { %v2712_v43 = vpop.eup %2711 }
 0x96f   : > { %v2060_v47 = vadd.f32 %v2057_v9, %v2052_v42  ;;  %v2045_v44 = vmul.f32 %v2712_v43, %v2013_v33  ;;  %2065 = sbr.rel (%p2388_p6) target bundleno = 2422 (0x976), region = 84 }
 0x971   : > { %v2053_v45 = vmul.f32 %v2049_v6, %v2045_v44 }
 0x973   : > { %v2061_v46 = vadd.f32 %v2057_v9, %v2053_v45 }
 0x974   : > { %2066 = vst.msk [vmem:[#allocation2] sm:$0xff] %vm706_vm1, %v2058_v10  ;;  %2067 = vst.msk [vmem:[#allocation2 + $0x8] sm:$0xff] %vm706_vm1, %v2059_v18 }
 0x975   : > { %2068 = vst.msk [vmem:[#allocation2 + $0x10] sm:$0xff] %vm706_vm1, %v2060_v47  ;;  %2069 = vst.msk [vmem:[#allocation2 + $0x18] sm:$0xff] %vm706_vm1, %v2061_v46 }
 0x976 PF: > { %p2389_p7 = scmp.ne.s32.totalorder %s2763_s29, 1 }
 0x977   : > { %s3400_s20 = sld [smem:[#allocation11_spill]] (!%p2389_p7) }
 0x978   : > { %2073 = sbr.rel (%p2389_p7) target bundleno = 2746 (0xaba), region = 88  ;;  %s3401_s19 = sld [smem:[#allocation12_spill]] (!%p2389_p7) }
 0x97d   : > { %v2076_v48 = vsel %vm706_vm1, %v2058_v10, 0.0  ;;  %v2082_v49 = vsel %vm706_vm1, %v2060_v47, 0.0  ;;  %v2079_v51 = vsel %vm706_vm1, %v2059_v18, 0.0  ;;  %v2085_v56 = vsel %vm706_vm1, %v2061_v46, 0.0  ;;  %v2390_v50 = vld [vmem:[%s3400_s20] ss:$0 sm:$0xff] }
 0x97e   : > { %2077 = vadd.xlane.f32.xlu0 %v2076_v48  ;;  %2083 = vadd.xlane.f32.xlu1 %v2082_v49  ;;  %v2391_v33 = vld [vmem:[%s3401_s19] ss:$0 sm:$0xff] }
 0x982   : > { %2080 = vadd.xlane.f32.xlu0 %v2079_v51  ;;  %2086 = vadd.xlane.f32.xlu1 %v2085_v56 }
 0xa07   : > { %v2078_v58 = vpop.xlane.xlu0 %2077  ;;  %v2084_v23 = vpop.xlane.xlu1 %2083 }
 0xa08   : > { %v2088_v52 = vmul.f32 0.015625, %v2078_v58  ;;  %v2090_v59 = vmul.f32 0.015625, %v2084_v23 }
 0xa0a   : > { %v2092_v57 = vsub.f32 %v2058_v10, %v2088_v52  ;;  %v2094_v61 = vsub.f32 %v2060_v47, %v2090_v59 }
 0xa0b   : > { %v2081_v24 = vpop.xlane.xlu0 %2080  ;;  %v2087_v55 = vpop.xlane.xlu1 %2086 }
 0xa0c   : > { %v2089_v62 = vmul.f32 0.015625, %v2081_v24  ;;  %v2091_v0 = vmul.f32 0.015625, %v2087_v55  ;;  %v2096_v1 = vmul.f32 %v2092_v57, %v2092_v57  ;;  %v2098_v2 = vmul.f32 %v2094_v61, %v2094_v61 }
 0xa0e   : > { %v2093_v60 = vsub.f32 %v2059_v18, %v2089_v62  ;;  %v2095_v53 = vsub.f32 %v2061_v46, %v2091_v0  ;;  %v2100_v28 = vsel %vm706_vm1, %v2096_v1, 0.0  ;;  %v2106_v29 = vsel %vm706_vm1, %v2098_v2, 0.0 }
 0xa0f   : > { %2101 = vadd.xlane.f32.xlu0 %v2100_v28 }
 0xa10   : > { %v2097_v63 = vmul.f32 %v2093_v60, %v2093_v60  ;;  %v2099_v35 = vmul.f32 %v2095_v53, %v2095_v53 }
 0xa12   : > { %v2103_v37 = vsel %vm706_vm1, %v2097_v63, 0.0  ;;  %v2109_v39 = vsel %vm706_vm1, %v2099_v35, 0.0 }
 0xa13   : > { %2107 = vadd.xlane.f32.xlu0 %v2106_v29  ;;  %2104 = vadd.xlane.f32.xlu1 %v2103_v37 }
 0xa17   : > { %2110 = vadd.xlane.f32.xlu1 %v2109_v39 }
 0xa98   : > { %v2102_v3 = vpop.xlane.xlu0 %2101 }
 0xa99   : > { %v2112_v27 = vmul.f32 0.015625, %v2102_v3 }
 0xa9b   : > { %v2116_v5 = vadd.f32 1e-05, %v2112_v27 }
 0xa9c   : > { %v2105_v6 = vpop.xlane.xlu1 %2104  ;;  %v2108_v7 = vpop.xlane.xlu0 %2107 }
 0xa9d   : > { %2713 = vrsqrt.f32 %v2116_v5  ;;  %v2113_v9 = vmul.f32 0.015625, %v2105_v6  ;;  %v2114_v21 = vmul.f32 0.015625, %v2108_v7 }
 0xa9f   : > { %v2117_v22 = vadd.f32 1e-05, %v2113_v9  ;;  %v2118_v10 = vadd.f32 1e-05, %v2114_v21 }
 0xaa0   : > { %v2111_v11 = vpop.xlane.xlu1 %2110 }
 0xaa1   : > { %2715 = vrsqrt.f32 %v2117_v22  ;;  %v2115_v12 = vmul.f32 0.015625, %v2111_v11 }
 0xaa2   : > { %2717 = vrsqrt.f32 %v2118_v10 }
 0xaa3   : > { %v2119_v13 = vadd.f32 1e-05, %v2115_v12 }
 0xaa5   : > { %2719 = vrsqrt.f32 %v2119_v13 }
 0xaaa   : > { %v2714_v36 = vpop.eup %2713 }
 0xaab   : > { %v2124_v54 = vmul.f32 %v2714_v36, %v2092_v57 }
 0xaad   : > { %v2134_v14 = vmul.f32 %v2390_v50, %v2124_v54 }
 0xaae   : > { %v2716_v8 = vpop.eup %2715 }
 0xaaf   : > { %v2718_v15 = vpop.eup %2717  ;;  %v2144_v25 = vadd.f32 %v2391_v33, %v2134_v14  ;;  %v2125_v4 = vmul.f32 %v2716_v8, %v2093_v60 }
 0xab0   : > { %v2126_v16 = vmul.f32 %v2718_v15, %v2094_v61 }
 0xab1   : > { %2148 = vst.msk [vmem:[#allocation2] sm:$0xff] %vm706_vm1, %v2144_v25  ;;  %v2135_v32 = vmul.f32 %v2390_v50, %v2125_v4 }
 0xab2   : > { %v2720_v31 = vpop.eup %2719  ;;  %v2136_v17 = vmul.f32 %v2390_v50, %v2126_v16 }
 0xab3   : > { %v2145_v18 = vadd.f32 %v2391_v33, %v2135_v32  ;;  %v2127_v19 = vmul.f32 %v2720_v31, %v2095_v53 }
 0xab4   : > { %v2146_v20 = vadd.f32 %v2391_v33, %v2136_v17 }
 0xab5   : > { %2149 = vst.msk [vmem:[#allocation2 + $0x8] sm:$0xff] %vm706_vm1, %v2145_v18  ;;  %v2137_v26 = vmul.f32 %v2390_v50, %v2127_v19 }
 0xab6   : > { %2150 = vst.msk [vmem:[#allocation2 + $0x10] sm:$0xff] %vm706_vm1, %v2146_v20 }
 0xab7   : > { %v2147_v30 = vadd.f32 %v2391_v33, %v2137_v26 }
 0xab9   : > { %2151 = vst.msk [vmem:[#allocation2 + $0x18] sm:$0xff] %vm706_vm1, %v2147_v30 }
 0xaba PF: > { %s3402_s25 = sld [smem:[#allocation6_spill]]  ;;  %s2775_s14 = smov [#allocation2]  }
 0xabb   : > { %s2162_s15 = sshll.u32 %s2775_s14, 4  ;;  %s2163_s15 = int_to_ptr.vmem [resolvable:$true] %s2162_s15 }
 0xabc   : > { %s2721_s22 = scalar_lea.vmem %s2163_s15, 512  ;;  %p2728_p12 = scmp.lt.s32.totalorder %s2163_s15, %s2163_s15 }
 0xabd   : > { %p2722_p9 = scmp.ne.s32.totalorder %s2163_s15, %s2721_s22  ;;  %p2729_p13 = scmp.lt.s32.totalorder %s2721_s22, %s2721_s22 }
 0xabf   : > { %p2730_p0 = por %p2729_p13, %p2728_p12 }
 0xac0   : > { %s3403_s16 = sadd.s32 4294967295, %s3402_s25  }
 0xac1   : > { %p3344_p8 = scmp.eq.s32.totalorder %s3403_s16, 1 }
 0xac3   : > { %p2723_p10 = pnand %p2722_p9, %p3344_p8 }
 0xac5   : > { %p2724_p11 = pneg %p2723_p10 }
 0xac7   : > { %p2731_p1 = pnand %p2730_p0, %p2724_p11 }
 0xac9   : > { %2734 = shalt.err (!%p2731_p1)
}
 0xaca   : > { %s2776_s30 = smov 128   ;;  %s2777_s26 = smov 8  }
 0xacb   : > { %s3405_s21 = sld [smem:[#allocation13_spill]] }
 0xad1   : > { %2647 = dma.vmem_to_hbm [thread:$0]  (%p3344_p8), %s2163_s15, 512, %s3405_s21, [#allocation3], %s2776_s30, %s2776_s30, %s2777_s26  }
 0xad2   : > { %2758 = dma.done.wait (%p3344_p8), [#allocation3], 512  }
 0xad3   : > { %2760 = vsyncadd (%p3344_p8), [#allocation3], 4294966784 }
 0xad4 PF: > { %s3406_s1 = sld [smem:[#allocation6_spill]] }
 0xad5   : > { %s3407_s29 = sld [smem:[#allocation5_spill]] }
 0xad6   : > { %s3408_s30 = sld [smem:[#allocation7_spill]] }
 0xada   : > { %s25_s15 = sadd.s32 1, %s3406_s1  }
 0xadb   : > { %p22_p2 = scmp.ge.s32.totalorder %s25_s15, 4  }
 0xadd   :  { %24 = sbr.rel (!%p22_p2) target bundleno = 9 (0x9), region = 146 }
 0xae2   :  { %2178 = vsyncpa [#allocation3], 1 }
 0xae3   :  { %2180 = vsyncpa [#allocation3 + $0x1], 1 }

</bundles_post_ra>
